<compile_context>
chip_gen: v5e
topology: v5e:2x2
jax: 0.10.0
libtpu: 0.0.40
codegen_flags: <defaults>
</compile_context>

<pallas_src>
import functools

import jax
import jax.numpy as jnp
import numpy as np
from jax.experimental import pallas as pl
from jax.experimental.pallas import tpu as pltpu

EPS = 1e-5
SUBLANE_BF16 = 16          # bf16 packs 16 rows per (8,128) vreg tile


def _round_up(x, m):
    return (x + m - 1) // m * m


# -----------------------------------------------------------------------------
# Pallas kernel: one batch element per grid step (grid axis is "parallel").
# Flat padded layout: pixel (r, x) at lane off + r*Wp + x;  lanes [0, off) and
# [off+L, BUFLEN) plus the 2 garbage columns per row are always exactly zero.
# -----------------------------------------------------------------------------
def upblock_kernel(x14_ref, x2p_ref, wt_ref, bt_ref, w1_ref, sh1_ref,
                   w2_ref, sh2_ref, o_ref, buf, *, H, W, off):
    Ho, Wo = 2 * H, 2 * W
    Wp = Wo + 2
    L = Ho * Wp
    buflen = buf.shape[-1]
    tap0 = off - Wp - 1                                # base offset of the (0,0) conv tap
    taps = [dy * Wp + dx for dy in range(3) for dx in range(3)]

    # In-kernel masks (no mask input DMA): 1.0 on real interior pixels, 0.0 on the
    # zero ring / garbage columns.
    q = jax.lax.broadcasted_iota(jnp.int32, (1, buflen), 1)
    interior = ((q >= off) & (q < off + L) & (((q - off) % Wp) < Wo)).astype(jnp.float32)
    colmask = interior[:, off:off + L]                 # (1, L): 1.0 where (p % Wp) < Wo

    # ---- ConvTranspose2d(in_c, out_c, kernel=2, stride=2): ONE matmul ---------
    # x14 holds x1 pre-spread onto the padded output lane positions for all four
    # (kh, kw) phases, so the matmul output is already interleaved and ring-padded.
    up = jnp.dot(wt_ref[...], x14_ref[0], preferred_element_type=jnp.float32)
    up = up + bt_ref[...] * interior                   # bias only on interior pixels
    buf[...] = up.astype(buf.dtype)                    # ONE full-width aligned store;
                                                       # also zeroes border + pad rows.

    # ---- conv1 (3x3, pad 1) on concat(x2, up): ONE matmul, K = 9*(SKP+CPO) ----
    # Every piece is a full bf16 sublane tile (channels padded to 16 in the wrapper).
    r1 = jnp.concatenate(
        [x2p_ref[0, :, tap0 + t: tap0 + t + L] for t in taps]
        + [buf[:, tap0 + t: tap0 + t + L] for t in taps], axis=0)
    c1 = jnp.dot(w1_ref[...], r1, preferred_element_type=jnp.float32)
    c1 = jnp.maximum(c1 + sh1_ref[...], 0.0) * colmask  # BN+ReLU, zero garbage cols
    buf[:, off:off + L] = c1.astype(buf.dtype)           # 128-aligned store, scratch reuse

    # ---- conv2 (3x3, pad 1): ONE matmul, K = 9*CPO -----------------------------
    r2 = jnp.concatenate([buf[:, tap0 + t: tap0 + t + L] for t in taps], axis=0)
    c2 = jnp.dot(w2_ref[...], r2, preferred_element_type=jnp.float32)
    o_ref[0] = jnp.maximum(c2 + sh2_ref[...], 0.0).astype(o_ref.dtype)  # bf16, lane-dense


# -----------------------------------------------------------------------------
# Parameter setup (deterministic, PyTorch-shaped) and BN folding helpers.
# -----------------------------------------------------------------------------
def init_params(key, in_c, out_c):
    ks = jax.random.split(key, 16)
    p = {}
    p["wt"] = 0.1 * jax.random.normal(ks[0], (in_c, out_c, 2, 2), jnp.float32)
    p["bt"] = 0.05 * jax.random.normal(ks[1], (out_c,), jnp.float32)
    p["w1"] = 0.1 * jax.random.normal(ks[2], (out_c, in_c, 3, 3), jnp.float32)
    p["b1"] = 0.05 * jax.random.normal(ks[3], (out_c,), jnp.float32)
    p["g1"] = 1.0 + 0.1 * jax.random.normal(ks[4], (out_c,), jnp.float32)
    p["be1"] = 0.05 * jax.random.normal(ks[5], (out_c,), jnp.float32)
    p["rm1"] = 0.1 * jax.random.normal(ks[6], (out_c,), jnp.float32)
    p["rv1"] = 0.5 + jax.random.uniform(ks[7], (out_c,), jnp.float32)
    p["w2"] = 0.1 * jax.random.normal(ks[8], (out_c, out_c, 3, 3), jnp.float32)
    p["b2"] = 0.05 * jax.random.normal(ks[9], (out_c,), jnp.float32)
    p["g2"] = 1.0 + 0.1 * jax.random.normal(ks[10], (out_c,), jnp.float32)
    p["be2"] = 0.05 * jax.random.normal(ks[11], (out_c,), jnp.float32)
    p["rm2"] = 0.1 * jax.random.normal(ks[12], (out_c,), jnp.float32)
    p["rv2"] = 0.5 + jax.random.uniform(ks[13], (out_c,), jnp.float32)
    return p


def _fold_conv_bn(w_oihw, b, gamma, beta, mean, var, groups, out_rows):
    """Fold eval-mode BN into the conv weight.  K columns are ordered per input-channel
    group as (tap = dy*3+dx major, padded-channel minor), matching the kernel's im2col
    stacking; output rows are zero-padded to `out_rows`."""
    out_c = w_oihw.shape[0]
    scale = gamma / jnp.sqrt(var + EPS)
    cols = []
    for start, cnt, pcnt in groups:
        wg = jnp.transpose(w_oihw[:, start:start + cnt], (0, 2, 3, 1))   # (oc, 3, 3, cnt)
        wg = jnp.pad(wg, ((0, 0), (0, 0), (0, 0), (0, pcnt - cnt)))
        cols.append(wg.reshape(out_c, 9 * pcnt))
    wm = jnp.concatenate(cols, axis=1) * scale[:, None]
    sh = ((b - mean) * scale + beta)[:, None]
    wm = jnp.pad(wm, ((0, out_rows - out_c), (0, 0)))
    sh = jnp.pad(sh, ((0, out_rows - out_c), (0, 0)))
    return wm.astype(jnp.bfloat16), sh.astype(jnp.float32)


# -----------------------------------------------------------------------------
# Wrapper: NCHW in/out.  NCHW reshapes for free into the kernel's channel-major
# flat layout; the wrapper only pads (channels to the bf16 sublane tile, lanes to
# the ring-padded 128-aligned layout) and pre-spreads the tiny x1.
# -----------------------------------------------------------------------------
def upblock_forward(x1_nchw, x2_nchw, params):
    N, in_c, H, W = x1_nchw.shape
    out_c = params["wt"].shape[1]
    skip_c = in_c - out_c
    Ho, Wo = 2 * H, 2 * W
    Wp = Wo + 2
    L = Ho * Wp
    OFF = _round_up(Wp + 1, 128)                       # 128-aligned interior offset
    BUFLEN = _round_up(OFF + L + Wp + 1, 128)          # padded flat-plane length
    SKP = _round_up(skip_c, SUBLANE_BF16)              # skip channels padded to bf16 tile
    CPO = _round_up(out_c, SUBLANE_BF16)               # up/out channels padded to bf16 tile
    assert x2_nchw.shape == (N, skip_c, Ho, Wo)

    # x1 pre-spread onto padded output lane positions for all 4 (kh, kw) phases.
    z = jnp.zeros_like(x1_nchw)
    blocks = []
    for kh in (0, 1):
        for kw in (0, 1):
            xw = jnp.stack([x1_nchw, z] if kw == 0 else [z, x1_nchw], axis=-1)
            xw = xw.reshape(N, in_c, H, Wo)            # value at column 2w+kw
            zr = jnp.zeros_like(xw)
            xh = jnp.stack([xw, zr] if kh == 0 else [zr, xw], axis=3)
            xh = xh.reshape(N, in_c, Ho, Wo)           # value at row 2h+kh
            blocks.append(xh)
    x4 = jnp.concatenate(blocks, axis=1)               # (N, 4*in_c, Ho, Wo)
    x4 = jnp.pad(x4, ((0, 0), (0, 0), (0, 0), (0, Wp - Wo))).reshape(N, 4 * in_c, L)
    x14 = jnp.pad(x4, ((0, 0), (0, 0), (OFF, BUFLEN - OFF - L))).astype(jnp.bfloat16)

    # Skip input, zero-padded (channels + lanes) into the same flat padded layout.
    x2f = jnp.pad(x2_nchw, ((0, 0), (0, 0), (0, 0), (0, Wp - Wo))).reshape(N, skip_c, L)
    x2p = jnp.pad(x2f, ((0, 0), (0, SKP - skip_c),
                        (OFF, BUFLEN - OFF - L))).astype(jnp.bfloat16)

    # ConvTranspose weight as (CPO, 4*in_c): rows oc (padded), cols (kh, kw, ic).
    wt4 = jnp.transpose(params["wt"], (2, 3, 0, 1)).reshape(4 * in_c, out_c).T
    wt4 = jnp.pad(wt4, ((0, CPO - out_c), (0, 0))).astype(jnp.bfloat16)
    bt4 = jnp.pad(params["bt"][:, None], ((0, CPO - out_c), (0, 0))).astype(jnp.float32)

    w1m, sh1 = _fold_conv_bn(params["w1"], params["b1"], params["g1"], params["be1"],
                             params["rm1"], params["rv1"],
                             groups=[(0, skip_c, SKP), (skip_c, out_c, CPO)],
                             out_rows=CPO)
    w2m, sh2 = _fold_conv_bn(params["w2"], params["b2"], params["g2"], params["be2"],
                             params["rm2"], params["rv2"],
                             groups=[(0, out_c, CPO)],
                             out_rows=out_c)

    kernel = functools.partial(upblock_kernel, H=H, W=W, off=OFF)

    flops = 2 * N * (CPO * 4 * in_c * BUFLEN
                     + CPO * 9 * (SKP + CPO) * L
                     + out_c * 9 * CPO * L)
    bytes_accessed = (N * (4 * in_c * BUFLEN + SKP * BUFLEN + out_c * L) * 2
                      + (CPO * 4 * in_c + CPO * 9 * (SKP + CPO) + out_c * 9 * CPO) * 2)

    grid_spec = pltpu.PrefetchScalarGridSpec(
        num_scalar_prefetch=0,
        grid=(N,),
        in_specs=[
            pl.BlockSpec((1, 4 * in_c, BUFLEN), lambda n: (n, 0, 0)),
            pl.BlockSpec((1, SKP, BUFLEN), lambda n: (n, 0, 0)),
            pl.BlockSpec((CPO, 4 * in_c), lambda n: (0, 0)),
            pl.BlockSpec((CPO, 1), lambda n: (0, 0)),
            pl.BlockSpec((CPO, 9 * (SKP + CPO)), lambda n: (0, 0)),
            pl.BlockSpec((CPO, 1), lambda n: (0, 0)),
            pl.BlockSpec((out_c, 9 * CPO), lambda n: (0, 0)),
            pl.BlockSpec((out_c, 1), lambda n: (0, 0)),
        ],
        out_specs=pl.BlockSpec((1, out_c, L), lambda n: (n, 0, 0)),
        scratch_shapes=[
            pltpu.VMEM((CPO, BUFLEN), jnp.bfloat16),   # single reused padded image buffer
        ],
    )

    out_flat = pl.pallas_call(
        kernel,
        out_shape=jax.ShapeDtypeStruct((N, out_c, L), jnp.bfloat16),
        grid_spec=grid_spec,
        # The scratch buffer is fully rewritten (including its zero ring) every step by
        # the full-width up-sample store, so the batch axis is safely "parallel"
        # (uses both TensorCores on v7x).
        compiler_params=pltpu.CompilerParams(
            dimension_semantics=("parallel",),
            vmem_limit_bytes=32 * 1024 * 1024),
        cost_estimate=pl.CostEstimate(flops=flops, transcendentals=0,
                                      bytes_accessed=bytes_accessed),
    )(x14, x2p, wt4, bt4, w1m, sh1, w2m, sh2)

    # Free reshape back to NCHW; drop the 2 garbage columns per row.  (A chained
    # conv block could consume the padded-stride layout directly and skip this.)
    return out_flat.reshape(N, out_c, Ho, Wp)[..., :Wo]


# -----------------------------------------------------------------------------
# Pure-JAX reference (NCHW, mirrors the PyTorch module in eval mode, f32).
# -----------------------------------------------------------------------------
def reference(x1, x2, p):
    N, in_c, H, W = x1.shape
    out_c = p["wt"].shape[1]
    Ho, Wo = 2 * H, 2 * W

    up = jnp.einsum("nihw,iokl->nohkwl", x1, p["wt"], precision="highest")
    up = up.reshape(N, out_c, Ho, Wo) + p["bt"][None, :, None, None]

    def conv3(x, w, b):
        y = jax.lax.conv_general_dilated(
            x, w, window_strides=(1, 1), padding=((1, 1), (1, 1)),
            dimension_numbers=("NCHW", "OIHW", "NCHW"),
            precision=jax.lax.Precision.HIGHEST)
        return y + b[None, :, None, None]

    def bn(x, g, be, m, v):
        return ((x - m[None, :, None, None]) / jnp.sqrt(v[None, :, None, None] + EPS)
                * g[None, :, None, None] + be[None, :, None, None])

    cat = jnp.concatenate([x2, up], axis=1)
    h = jax.nn.relu(bn(conv3(cat, p["w1"], p["b1"]), p["g1"], p["be1"], p["rm1"], p["rv1"]))
    o = jax.nn.relu(bn(conv3(h, p["w2"], p["b2"]), p["g2"], p["be2"], p["rm2"], p["rv2"]))
    return o


# -----------------------------------------------------------------------------
if __name__ == "__main__":
    key = jax.random.PRNGKey(0)
    N, in_c, out_c, H, W = 2, 8, 4, 8, 8

    k1, k2, kp = jax.random.split(key, 3)
    input_1 = jax.random.normal(k1, (N, in_c, H, W), jnp.float32)                   # NCHW
    input_2 = jax.random.normal(k2, (N, in_c - out_c, 2 * H, 2 * W), jnp.float32)   # NCHW
    params = init_params(kp, in_c, out_c)

    fwd = jax.jit(upblock_forward)
    out = jax.block_until_ready(fwd(input_1, input_2, params))
    assert out.shape == (N, out_c, 2 * H, 2 * W)

    ref = jax.block_until_ready(reference(input_1, input_2, params))
    # bf16 operands + bf16 output with f32 accumulation vs f32 reference.
    np.testing.assert_allclose(np.asarray(out, dtype=np.float32), np.asarray(ref),
                               rtol=3e-2, atol=2e-2)

    print("KERNEL_OK")
</pallas_src>

<mosaic_0001>
module attributes {stable_mosaic.version = 11 : i64} {
  func.func @upblock_kernel(%arg0: i32, %arg1: memref<1x32x512xbf16, #tpu.memory_space<vmem>>, %arg2: memref<1x16x512xbf16, #tpu.memory_space<vmem>>, %arg3: memref<16x32xbf16, #tpu.memory_space<vmem>>, %arg4: memref<16x1xf32, #tpu.memory_space<vmem>>, %arg5: memref<16x288xbf16, #tpu.memory_space<vmem>>, %arg6: memref<16x1xf32, #tpu.memory_space<vmem>>, %arg7: memref<4x144xbf16, #tpu.memory_space<vmem>>, %arg8: memref<4x1xf32, #tpu.memory_space<vmem>>, %arg9: memref<1x4x288xbf16, #tpu.memory_space<vmem>>, %arg10: memref<16x512xbf16, #tpu.memory_space<vmem>>) attributes {dimension_semantics = [#tpu.dimension_semantics<parallel>], iteration_bounds = array<i64: 2>, scalar_prefetch = 0 : i64, scratch_operands = 1 : i64, tpu.core_type = #tpu.core_type<tc>, window_params = [{transform_indices = @transform_0, window_bounds = array<i64: 1, 32, 512>}, {transform_indices = @transform_1, window_bounds = array<i64: 1, 16, 512>}, {pipeline_mode = #tpu.pipeline_mode<synchronous>, transform_indices = @transform_2, window_bounds = array<i64: 16, 32>}, {pipeline_mode = #tpu.pipeline_mode<synchronous>, transform_indices = @transform_3, window_bounds = array<i64: 16, 1>}, {pipeline_mode = #tpu.pipeline_mode<synchronous>, transform_indices = @transform_4, window_bounds = array<i64: 16, 288>}, {pipeline_mode = #tpu.pipeline_mode<synchronous>, transform_indices = @transform_5, window_bounds = array<i64: 16, 1>}, {pipeline_mode = #tpu.pipeline_mode<synchronous>, transform_indices = @transform_6, window_bounds = array<i64: 4, 144>}, {pipeline_mode = #tpu.pipeline_mode<synchronous>, transform_indices = @transform_7, window_bounds = array<i64: 4, 1>}, {transform_indices = @transform_8, window_bounds = array<i64: 1, 4, 288>}]} {
    %0 = tpu.iota {dimensions = array<i32: 1>} : vector<1x512xi32>
    %c128_i32 = arith.constant 128 : i32
    %1 = vector.broadcast %c128_i32 : i32 to vector<1x512xi32>
    %2 = arith.cmpi sge, %0, %1 : vector<1x512xi32>
    %c416_i32 = arith.constant 416 : i32
    %3 = vector.broadcast %c416_i32 : i32 to vector<1x512xi32>
    %4 = arith.cmpi slt, %0, %3 : vector<1x512xi32>
    %5 = arith.andi %2, %4 : vector<1x512xi1>
    %c128_i32_0 = arith.constant 128 : i32
    %6 = vector.broadcast %c128_i32_0 : i32 to vector<1x512xi32>
    %7 = arith.subi %0, %6 : vector<1x512xi32>
    %c18_i32 = arith.constant 18 : i32
    %c0_i32 = arith.constant 0 : i32
    %8 = arith.cmpi eq, %c18_i32, %c0_i32 : i32
    %c1_i32 = arith.constant 1 : i32
    %9 = arith.select %8, %c1_i32, %c18_i32 : i32
    %10 = vector.broadcast %9 : i32 to vector<1x512xi32>
    %11 = arith.remsi %7, %10 : vector<1x512xi32>
    %c0_i32_1 = arith.constant 0 : i32
    %12 = vector.broadcast %c0_i32_1 : i32 to vector<1x512xi32>
    %13 = arith.cmpi ne, %11, %12 : vector<1x512xi32>
    %c0_i32_2 = arith.constant 0 : i32
    %14 = vector.broadcast %c0_i32_2 : i32 to vector<1x512xi32>
    %15 = arith.cmpi slt, %11, %14 : vector<1x512xi32>
    %c0_i32_3 = arith.constant 0 : i32
    %16 = arith.cmpi slt, %9, %c0_i32_3 : i32
    %17 = vector.broadcast %16 : i1 to vector<1x512xi1>
    %18 = vector.broadcast %17 : vector<1x512xi1> to vector<1x512xi1>
    %19 = arith.xori %15, %18 : vector<1x512xi1>
    %20 = arith.andi %19, %13 : vector<1x512xi1>
    %21 = vector.broadcast %9 : i32 to vector<1x512xi32>
    %22 = arith.addi %11, %21 : vector<1x512xi32>
    %23 = arith.select %20, %22, %11 : vector<1x512xi1>, vector<1x512xi32>
    %c16_i32 = arith.constant 16 : i32
    %24 = vector.broadcast %c16_i32 : i32 to vector<1x512xi32>
    %25 = arith.cmpi slt, %23, %24 : vector<1x512xi32>
    %26 = arith.andi %5, %25 : vector<1x512xi1>
    %27 = arith.extui %26 : vector<1x512xi1> to vector<1x512xi32>
    %28 = arith.sitofp %27 : vector<1x512xi32> to vector<1x512xf32>
    %29 = vector.extract_strided_slice %28 {offsets = [0, 128], sizes = [1, 288], strides = [1, 1]} : vector<1x512xf32> to vector<1x288xf32>
    %c0 = arith.constant 0 : index
    %c0_4 = arith.constant 0 : index
    %30 = vector.load %arg3[%c0, %c0_4] : memref<16x32xbf16, #tpu.memory_space<vmem>>, vector<16x32xbf16>
    %c0_5 = arith.constant 0 : index
    %c0_6 = arith.constant 0 : index
    %c0_7 = arith.constant 0 : index
    %31 = vector.load %arg1[%c0_5, %c0_6, %c0_7] : memref<1x32x512xbf16, #tpu.memory_space<vmem>>, vector<1x32x512xbf16>
    %32 = vector.shape_cast %31 : vector<1x32x512xbf16> to vector<32x512xbf16>
    %cst = arith.constant dense<0.000000e+00> : vector<16x512xf32>
    %33 = tpu.matmul %30, %32, %cst {dimension_numbers = #tpu.dot_dimension_numbers<[1], [0], [0], [1], [0, 0, 1, 1], [], []>} : vector<16x32xbf16>, vector<32x512xbf16>, vector<16x512xf32> -> vector<16x512xf32>
    %c0_8 = arith.constant 0 : index
    %c0_9 = arith.constant 0 : index
    %34 = vector.load %arg4[%c0_8, %c0_9] : memref<16x1xf32, #tpu.memory_space<vmem>>, vector<16x1xf32>
    %35 = vector.broadcast %34 : vector<16x1xf32> to vector<16x512xf32>
    %36 = vector.broadcast %28 : vector<1x512xf32> to vector<16x512xf32>
    %37 = arith.mulf %35, %36 : vector<16x512xf32>
    %38 = arith.addf %33, %37 : vector<16x512xf32>
    %39 = arith.truncf %38 : vector<16x512xf32> to vector<16x512xbf16>
    %c0_10 = arith.constant 0 : index
    %c0_11 = arith.constant 0 : index
    %40 = vector.load %arg10[%c0_10, %c0_11] : memref<16x512xbf16, #tpu.memory_space<vmem>>, vector<16x512xbf16>
    tpu.vector_store %arg10[%c0_10, %c0_11], %39 {strides = array<i32>} : memref<16x512xbf16, #tpu.memory_space<vmem>>, vector<16x512xbf16>,
    %c0_12 = arith.constant 0 : index
    %c0_13 = arith.constant 0 : index
    %c109 = arith.constant 109 : index
    %41 = vector.load %arg2[%c0_12, %c0_13, %c109] : memref<1x16x512xbf16, #tpu.memory_space<vmem>>, vector<1x16x288xbf16>
    %42 = vector.shape_cast %41 : vector<1x16x288xbf16> to vector<16x288xbf16>
    %c0_14 = arith.constant 0 : index
    %c0_15 = arith.constant 0 : index
    %c110 = arith.constant 110 : index
    %43 = vector.load %arg2[%c0_14, %c0_15, %c110] : memref<1x16x512xbf16, #tpu.memory_space<vmem>>, vector<1x16x288xbf16>
    %44 = vector.shape_cast %43 : vector<1x16x288xbf16> to vector<16x288xbf16>
    %c0_16 = arith.constant 0 : index
    %c0_17 = arith.constant 0 : index
    %c111 = arith.constant 111 : index
    %45 = vector.load %arg2[%c0_16, %c0_17, %c111] : memref<1x16x512xbf16, #tpu.memory_space<vmem>>, vector<1x16x288xbf16>
    %46 = vector.shape_cast %45 : vector<1x16x288xbf16> to vector<16x288xbf16>
    %c0_18 = arith.constant 0 : index
    %c0_19 = arith.constant 0 : index
    %c127 = arith.constant 127 : index
    %47 = vector.load %arg2[%c0_18, %c0_19, %c127] : memref<1x16x512xbf16, #tpu.memory_space<vmem>>, vector<1x16x288xbf16>
    %48 = vector.shape_cast %47 : vector<1x16x288xbf16> to vector<16x288xbf16>
    %c0_20 = arith.constant 0 : index
    %c0_21 = arith.constant 0 : index
    %c128 = arith.constant 128 : index
    %49 = vector.load %arg2[%c0_20, %c0_21, %c128] : memref<1x16x512xbf16, #tpu.memory_space<vmem>>, vector<1x16x288xbf16>
    %50 = vector.shape_cast %49 : vector<1x16x288xbf16> to vector<16x288xbf16>
    %c0_22 = arith.constant 0 : index
    %c0_23 = arith.constant 0 : index
    %c129 = arith.constant 129 : index
    %51 = vector.load %arg2[%c0_22, %c0_23, %c129] : memref<1x16x512xbf16, #tpu.memory_space<vmem>>, vector<1x16x288xbf16>
    %52 = vector.shape_cast %51 : vector<1x16x288xbf16> to vector<16x288xbf16>
    %c0_24 = arith.constant 0 : index
    %c0_25 = arith.constant 0 : index
    %c145 = arith.constant 145 : index
    %53 = vector.load %arg2[%c0_24, %c0_25, %c145] : memref<1x16x512xbf16, #tpu.memory_space<vmem>>, vector<1x16x288xbf16>
    %54 = vector.shape_cast %53 : vector<1x16x288xbf16> to vector<16x288xbf16>
    %c0_26 = arith.constant 0 : index
    %c0_27 = arith.constant 0 : index
    %c146 = arith.constant 146 : index
    %55 = vector.load %arg2[%c0_26, %c0_27, %c146] : memref<1x16x512xbf16, #tpu.memory_space<vmem>>, vector<1x16x288xbf16>
    %56 = vector.shape_cast %55 : vector<1x16x288xbf16> to vector<16x288xbf16>
    %c0_28 = arith.constant 0 : index
    %c0_29 = arith.constant 0 : index
    %c147 = arith.constant 147 : index
    %57 = vector.load %arg2[%c0_28, %c0_29, %c147] : memref<1x16x512xbf16, #tpu.memory_space<vmem>>, vector<1x16x288xbf16>
    %58 = vector.shape_cast %57 : vector<1x16x288xbf16> to vector<16x288xbf16>
    %c0_30 = arith.constant 0 : index
    %c109_31 = arith.constant 109 : index
    %59 = vector.load %arg10[%c0_30, %c109_31] : memref<16x512xbf16, #tpu.memory_space<vmem>>, vector<16x288xbf16>
    %c0_32 = arith.constant 0 : index
    %c110_33 = arith.constant 110 : index
    %60 = vector.load %arg10[%c0_32, %c110_33] : memref<16x512xbf16, #tpu.memory_space<vmem>>, vector<16x288xbf16>
    %c0_34 = arith.constant 0 : index
    %c111_35 = arith.constant 111 : index
    %61 = vector.load %arg10[%c0_34, %c111_35] : memref<16x512xbf16, #tpu.memory_space<vmem>>, vector<16x288xbf16>
    %c0_36 = arith.constant 0 : index
    %c127_37 = arith.constant 127 : index
    %62 = vector.load %arg10[%c0_36, %c127_37] : memref<16x512xbf16, #tpu.memory_space<vmem>>, vector<16x288xbf16>
    %c0_38 = arith.constant 0 : index
    %c128_39 = arith.constant 128 : index
    %63 = vector.load %arg10[%c0_38, %c128_39] : memref<16x512xbf16, #tpu.memory_space<vmem>>, vector<16x288xbf16>
    %c0_40 = arith.constant 0 : index
    %c129_41 = arith.constant 129 : index
    %64 = vector.load %arg10[%c0_40, %c129_41] : memref<16x512xbf16, #tpu.memory_space<vmem>>, vector<16x288xbf16>
    %c0_42 = arith.constant 0 : index
    %c145_43 = arith.constant 145 : index
    %65 = vector.load %arg10[%c0_42, %c145_43] : memref<16x512xbf16, #tpu.memory_space<vmem>>, vector<16x288xbf16>
    %c0_44 = arith.constant 0 : index
    %c146_45 = arith.constant 146 : index
    %66 = vector.load %arg10[%c0_44, %c146_45] : memref<16x512xbf16, #tpu.memory_space<vmem>>, vector<16x288xbf16>
    %c0_46 = arith.constant 0 : index
    %c147_47 = arith.constant 147 : index
    %67 = vector.load %arg10[%c0_46, %c147_47] : memref<16x512xbf16, #tpu.memory_space<vmem>>, vector<16x288xbf16>
    %68 = tpu.concatenate %42, %44, %46, %48, %50, %52, %54, %56, %58, %59, %60, %61, %62, %63, %64, %65 in 0 : vector<16x288xbf16>, vector<16x288xbf16>, vector<16x288xbf16>, vector<16x288xbf16>, vector<16x288xbf16>, vector<16x288xbf16>, vector<16x288xbf16>, vector<16x288xbf16>, vector<16x288xbf16>, vector<16x288xbf16>, vector<16x288xbf16>, vector<16x288xbf16>, vector<16x288xbf16>, vector<16x288xbf16>, vector<16x288xbf16>, vector<16x288xbf16> -> vector<256x288xbf16>
    %69 = tpu.concatenate %66, %67 in 0 : vector<16x288xbf16>, vector<16x288xbf16> -> vector<32x288xbf16>
    %70 = tpu.concatenate %68, %69 in 0 : vector<256x288xbf16>, vector<32x288xbf16> -> vector<288x288xbf16>
    %c0_48 = arith.constant 0 : index
    %c0_49 = arith.constant 0 : index
    %71 = vector.load %arg5[%c0_48, %c0_49] : memref<16x288xbf16, #tpu.memory_space<vmem>>, vector<16x288xbf16>
    %cst_50 = arith.constant dense<0.000000e+00> : vector<16x288xf32>
    %72 = tpu.matmul %71, %70, %cst_50 {dimension_numbers = #tpu.dot_dimension_numbers<[1], [0], [0], [1], [0, 0, 1, 1], [], []>} : vector<16x288xbf16>, vector<288x288xbf16>, vector<16x288xf32> -> vector<16x288xf32>
    %c0_51 = arith.constant 0 : index
    %c0_52 = arith.constant 0 : index
    %73 = vector.load %arg6[%c0_51, %c0_52] : memref<16x1xf32, #tpu.memory_space<vmem>>, vector<16x1xf32>
    %74 = vector.broadcast %73 : vector<16x1xf32> to vector<16x288xf32>
    %75 = arith.addf %72, %74 : vector<16x288xf32>
    %cst_53 = arith.constant 0.000000e+00 : f32
    %76 = vector.broadcast %cst_53 : f32 to vector<16x288xf32>
    %77 = arith.maximumf %75, %76 : vector<16x288xf32>
    %78 = vector.broadcast %29 : vector<1x288xf32> to vector<16x288xf32>
    %79 = arith.mulf %77, %78 : vector<16x288xf32>
    %80 = arith.truncf %79 : vector<16x288xf32> to vector<16x288xbf16>
    %c0_54 = arith.constant 0 : index
    %c128_55 = arith.constant 128 : index
    %81 = vector.load %arg10[%c0_54, %c128_55] : memref<16x512xbf16, #tpu.memory_space<vmem>>, vector<16x288xbf16>
    tpu.vector_store %arg10[%c0_54, %c128_55], %80 {strides = array<i32>} : memref<16x512xbf16, #tpu.memory_space<vmem>>, vector<16x288xbf16>,
    %c0_56 = arith.constant 0 : index
    %c109_57 = arith.constant 109 : index
    %82 = vector.load %arg10[%c0_56, %c109_57] : memref<16x512xbf16, #tpu.memory_space<vmem>>, vector<16x288xbf16>
    %c0_58 = arith.constant 0 : index
    %c110_59 = arith.constant 110 : index
    %83 = vector.load %arg10[%c0_58, %c110_59] : memref<16x512xbf16, #tpu.memory_space<vmem>>, vector<16x288xbf16>
    %c0_60 = arith.constant 0 : index
    %c111_61 = arith.constant 111 : index
    %84 = vector.load %arg10[%c0_60, %c111_61] : memref<16x512xbf16, #tpu.memory_space<vmem>>, vector<16x288xbf16>
    %c0_62 = arith.constant 0 : index
    %c127_63 = arith.constant 127 : index
    %85 = vector.load %arg10[%c0_62, %c127_63] : memref<16x512xbf16, #tpu.memory_space<vmem>>, vector<16x288xbf16>
    %c0_64 = arith.constant 0 : index
    %c128_65 = arith.constant 128 : index
    %86 = vector.load %arg10[%c0_64, %c128_65] : memref<16x512xbf16, #tpu.memory_space<vmem>>, vector<16x288xbf16>
    %c0_66 = arith.constant 0 : index
    %c129_67 = arith.constant 129 : index
    %87 = vector.load %arg10[%c0_66, %c129_67] : memref<16x512xbf16, #tpu.memory_space<vmem>>, vector<16x288xbf16>
    %c0_68 = arith.constant 0 : index
    %c145_69 = arith.constant 145 : index
    %88 = vector.load %arg10[%c0_68, %c145_69] : memref<16x512xbf16, #tpu.memory_space<vmem>>, vector<16x288xbf16>
    %c0_70 = arith.constant 0 : index
    %c146_71 = arith.constant 146 : index
    %89 = vector.load %arg10[%c0_70, %c146_71] : memref<16x512xbf16, #tpu.memory_space<vmem>>, vector<16x288xbf16>
    %c0_72 = arith.constant 0 : index
    %c147_73 = arith.constant 147 : index
    %90 = vector.load %arg10[%c0_72, %c147_73] : memref<16x512xbf16, #tpu.memory_space<vmem>>, vector<16x288xbf16>
    %91 = tpu.concatenate %82, %83, %84, %85, %86, %87, %88, %89, %90 in 0 : vector<16x288xbf16>, vector<16x288xbf16>, vector<16x288xbf16>, vector<16x288xbf16>, vector<16x288xbf16>, vector<16x288xbf16>, vector<16x288xbf16>, vector<16x288xbf16>, vector<16x288xbf16> -> vector<144x288xbf16>
    %c0_74 = arith.constant 0 : index
    %c0_75 = arith.constant 0 : index
    %92 = vector.load %arg7[%c0_74, %c0_75] : memref<4x144xbf16, #tpu.memory_space<vmem>>, vector<4x144xbf16>
    %cst_76 = arith.constant dense<0.000000e+00> : vector<4x288xf32>
    %93 = tpu.matmul %92, %91, %cst_76 {dimension_numbers = #tpu.dot_dimension_numbers<[1], [0], [0], [1], [0, 0, 1, 1], [], []>} : vector<4x144xbf16>, vector<144x288xbf16>, vector<4x288xf32> -> vector<4x288xf32>
    %c0_77 = arith.constant 0 : index
    %c0_78 = arith.constant 0 : index
    %94 = vector.load %arg8[%c0_77, %c0_78] : memref<4x1xf32, #tpu.memory_space<vmem>>, vector<4x1xf32>
    %95 = vector.broadcast %94 : vector<4x1xf32> to vector<4x288xf32>
    %96 = arith.addf %93, %95 : vector<4x288xf32>
    %cst_79 = arith.constant 0.000000e+00 : f32
    %97 = vector.broadcast %cst_79 : f32 to vector<4x288xf32>
    %98 = arith.maximumf %96, %97 : vector<4x288xf32>
    %99 = arith.truncf %98 : vector<4x288xf32> to vector<4x288xbf16>
    %c0_80 = arith.constant 0 : index
    %c0_81 = arith.constant 0 : index
    %c0_82 = arith.constant 0 : index
    %100 = vector.load %arg9[%c0_80, %c0_81, %c0_82] : memref<1x4x288xbf16, #tpu.memory_space<vmem>>, vector<1x4x288xbf16>
    %101 = vector.shape_cast %100 : vector<1x4x288xbf16> to vector<4x288xbf16>
    %102 = vector.shape_cast %99 : vector<4x288xbf16> to vector<1x4x288xbf16>
    tpu.vector_store %arg9[%c0_80, %c0_81, %c0_82], %102 {strides = array<i32>} : memref<1x4x288xbf16, #tpu.memory_space<vmem>>, vector<1x4x288xbf16>,
    return
  }
  func.func @transform_0(%arg0: i32) -> (i32, i32, i32) {
    %c0_i32 = arith.constant 0 : i32
    %c0_i32_0 = arith.constant 0 : i32
    %c0_i32_1 = arith.constant 0 : i32
    return %arg0, %c0_i32, %c0_i32_0 : i32, i32, i32
  }
  func.func @transform_1(%arg0: i32) -> (i32, i32, i32) {
    %c0_i32 = arith.constant 0 : i32
    %c0_i32_0 = arith.constant 0 : i32
    %c0_i32_1 = arith.constant 0 : i32
    return %arg0, %c0_i32, %c0_i32_0 : i32, i32, i32
  }
  func.func @transform_2(%arg0: i32) -> (i32, i32) {
    %c0_i32 = arith.constant 0 : i32
    %c0_i32_0 = arith.constant 0 : i32
    %c0_i32_1 = arith.constant 0 : i32
    return %c0_i32, %c0_i32_0 : i32, i32
  }
  func.func @transform_3(%arg0: i32) -> (i32, i32) {
    %c0_i32 = arith.constant 0 : i32
    %c0_i32_0 = arith.constant 0 : i32
    %c0_i32_1 = arith.constant 0 : i32
    return %c0_i32, %c0_i32_0 : i32, i32
  }
  func.func @transform_4(%arg0: i32) -> (i32, i32) {
    %c0_i32 = arith.constant 0 : i32
    %c0_i32_0 = arith.constant 0 : i32
    %c0_i32_1 = arith.constant 0 : i32
    return %c0_i32, %c0_i32_0 : i32, i32
  }
  func.func @transform_5(%arg0: i32) -> (i32, i32) {
    %c0_i32 = arith.constant 0 : i32
    %c0_i32_0 = arith.constant 0 : i32
    %c0_i32_1 = arith.constant 0 : i32
    return %c0_i32, %c0_i32_0 : i32, i32
  }
  func.func @transform_6(%arg0: i32) -> (i32, i32) {
    %c0_i32 = arith.constant 0 : i32
    %c0_i32_0 = arith.constant 0 : i32
    %c0_i32_1 = arith.constant 0 : i32
    return %c0_i32, %c0_i32_0 : i32, i32
  }
  func.func @transform_7(%arg0: i32) -> (i32, i32) {
    %c0_i32 = arith.constant 0 : i32
    %c0_i32_0 = arith.constant 0 : i32
    %c0_i32_1 = arith.constant 0 : i32
    return %c0_i32, %c0_i32_0 : i32, i32
  }
  func.func @transform_8(%arg0: i32) -> (i32, i32, i32) {
    %c0_i32 = arith.constant 0 : i32
    %c0_i32_0 = arith.constant 0 : i32
    %c0_i32_1 = arith.constant 0 : i32
    return %arg0, %c0_i32, %c0_i32_0 : i32, i32, i32
  }
}

</mosaic_0001>

<bundles_post_ra>
// kernel: upblock_forward.1
= control target key start
LH: loop header
LB: loop body
LE: loop exit
PB: predicated region body
PF: predicated region fallthrough
CT: control target
= control target key end

     0   :  { %s2016_s27 = smov 0   ;;  %s2867_s0 = inlined_call_operand.vmem [shape: bf16[2,32,512], index: 0, kind: input, shape index: {}]   ;;  %s2868_s1 = inlined_call_operand.vmem [shape: bf16[2,16,512], index: 1, kind: input, shape index: {}]   ;;  %s2869_s2 = inlined_call_operand.vmem [shape: bf16[16,32], index: 2, kind: input, shape index: {}]   ;;  %s2870_s3 = inlined_call_operand.vmem [shape: f32[16,1], index: 3, kind: input, shape index: {}]   ;;  %s2871_s4 = inlined_call_operand.vmem [shape: bf16[16,288], index: 4, kind: input, shape index: {}]   ;;  %s2872_s5 = inlined_call_operand.vmem [shape: f32[16,1], index: 5, kind: input, shape index: {}]   ;;  %s2873_s6 = inlined_call_operand.vmem [shape: bf16[4,144], index: 6, kind: input, shape index: {}]   ;;  %s2874_s7 = inlined_call_operand.vmem [shape: f32[4,1], index: 7, kind: input, shape index: {}]   ;;  %s2875_s8 = inlined_call_operand.vmem [shape: bf16[2,4,288], index: 8, kind: output, shape index: {}]  }
   0x1 LB: > { %s1734_s28 = sadd.s32 4294967295, %s1958_s27   ;;  %p1738_p0 = scmp.ge.s32.totalorder %s1958_s27, 1  ;;  %s1958_s27 = sphi %s2016_s27, %s18_s27  }
   0x2   : > { %p272_p1 = scmp.lt.s32.totalorder %s1958_s27, 3 }
   0x4   : > { %p273_p2 = pnand %p1738_p0, %p272_p1 }
   0x5   : > { %p311_p3 = scmp.lt.s32.totalorder (!%p273_p2), %s1734_s28, 1  ;;  %s1961_s19 = smov (!%p273_p2), 127  }
   0x6   : > { %276 = sbr.rel (%p273_p2) target bundleno = 1281 (0x501), region = 52  ;;  %s1962_s22 = smov (!%p273_p2), 126  }
   0x7   : > { %s1963_s23 = smov (!%p273_p2), 110   ;;  %s1964_s24 = smov (!%p273_p2), 91  }
   0x8   : > { %s1965_s25 = smov (!%p273_p2), 92   ;;  %s1966_s26 = smov (!%p273_p2), 108  }
   0x9   : > { %s1967_s29 = smov (!%p273_p2), 109   ;;  %s1968_s30 = smov (!%p273_p2), 90  }
   0xb   : > { %v509_v0 = vld [vmem:[%s2870_s3] sm:$0xff]  ;;  %v1960_v1 = vmov 0   ;;  %s2877_s28 = smov (!%p311_p3, %s1734_s28), 1  ;;  %v510_v5 = vld [vmem:[%s2870_s3 + $0x8] sm:$0xff]  ;;  %vm574_vm0 = vcmask 261120   ;;  %v327_v49 = vlaneseq }
   0xc   : > { %1949 = vset.pattern.permute.xlu0 %v1960_v1  ;;  %1950 = vset.pattern.permute.xlu2 %v1960_v1  ;;  %s1895_s9 = sshll.u32 %s2877_s28, 5  ;;  %s1894_s10 = sshll.u32 %s2877_s28, 6  ;;  %v1896_v33 = vld [vmem:[%s2869_s2] sm:$0xff] }
   0xd   : > { %513 = vperm.xlu0 %1949, %v509_v0   ;;  %1951 = vset.pattern.permute.xlu1 %v1960_v1  ;;  %s2037_s13 = scalar_lea.vmem %s2868_s1, %s1895_s9  ;;  %s2042_s16 = scalar_lea.vmem %s2867_s0, %s1894_s10  ;;  %v2126_v50 = vand.u32 127, %v327_v49 }
   0xe   : > { %v1792_v2 = vld [vmem:[%s2037_s13] sm:$0xf]  ;;  %v1907_v3 = vld [vmem:[%s2037_s13 + $0xc] sm:$0xf0]  ;;  %v1901_v8 = vld [vmem:[%s2042_s16 + $0x24] sm:$0xf] }
   0xf   : > { %v1772_v4 = vld [vmem:[%s2042_s16 + $0x20] sm:$0xf]  ;;  %v2050_v6 = vor.u32 %v1907_v3, %v1792_v2  ;;  %v1903_v7 = vld [vmem:[%s2042_s16 + $0x2c] sm:$0xf0]  ;;  %v1774_v9 = vld [vmem:[%s2042_s16 + $0x30] sm:$0xf0] }
  0x10   : > { %v1773_v10 = vor.u32 %v1903_v7, %v1772_v4  ;;  %v1777_v11 = vor.u32 %v1901_v8, %v1774_v9  ;;  %v1780_v12 = vld [vmem:[%s2042_s16 + $0x28] sm:$0xf]  ;;  %v1904_v13 = vld [vmem:[%s2042_s16 + $0x34] sm:$0xf0]  ;;  %v1902_v14 = vld [vmem:[%s2042_s16 + $0x2c] sm:$0xf] }
  0x11   : > { %674 = vrot.lane.b32.xlu1 %v2050_v6, %s1961_s19  ;;  %v1781_v15 = vor.u32 %v1904_v13, %v1780_v12  ;;  %v1782_v16 = vld [vmem:[%s2042_s16 + $0x38] sm:$0xf0]  ;;  %v1756_v17 = vld [vmem:[%s2042_s16] sm:$0xf]  ;;  %v1899_v18 = vld [vmem:[%s2042_s16 + $0xc] sm:$0xf0] }
  0x12   : > { %584 = vmatpush.bf16.msra.mxu0 %v1773_v10  ;;  %598 = vmatpush.bf16.msra.mxu1 %v1777_v11  ;;  %v1785_v19 = vor.u32 %v1902_v14, %v1782_v16  ;;  %v1757_v20 = vor.u32 %v1899_v18, %v1756_v17  ;;  %v1897_v21 = vld [vmem:[%s2042_s16 + $0x4] sm:$0xf]  ;;  %v1758_v22 = vld [vmem:[%s2042_s16 + $0x10] sm:$0xf0]  ;;  %v1764_v23 = vld [vmem:[%s2042_s16 + $0x8] sm:$0xf] }
  0x13   : > { %612 = vmatpush.bf16.msra.mxu2 %v1781_v15  ;;  %v1761_v24 = vor.u32 %v1897_v21, %v1758_v22  ;;  %v1900_v25 = vld [vmem:[%s2042_s16 + $0x14] sm:$0xf0]  ;;  %v1898_v26 = vld [vmem:[%s2042_s16 + $0xc] sm:$0xf]  ;;  %v1766_v27 = vld [vmem:[%s2042_s16 + $0x18] sm:$0xf0] }
  0x14   : > { %626 = vmatpush.bf16.msra.mxu3 %v1785_v19  ;;  %v1765_v28 = vor.u32 %v1900_v25, %v1764_v23  ;;  %v1769_v29 = vor.u32 %v1898_v26, %v1766_v27  ;;  %v1905_v30 = vld [vmem:[%s2037_s13 + $0x4] sm:$0xf]  ;;  %v1794_v31 = vld [vmem:[%s2037_s13 + $0x10] sm:$0xf0]  ;;  %v1800_v32 = vld [vmem:[%s2037_s13 + $0x8] sm:$0xf] }
  0x15   : > { %518 = vperm.xlu0 %1949, %v510_v5   ;;  %v1908_v34 = vld [vmem:[%s2037_s13 + $0x14] sm:$0xf0]  ;;  %v2076_v35 = vor.u32 %v1905_v30, %v1794_v31  ;;  %v1906_v37 = vld [vmem:[%s2037_s13 + $0xc] sm:$0xf]  ;;  %v1802_v38 = vld [vmem:[%s2037_s13 + $0x18] sm:$0xf0] }
  0x16   : > { %585 = vmatpush.bf16.msra.mxu0 %v1757_v20  ;;  %599 = vmatpush.bf16.msra.mxu1 %v1761_v24  ;;  %v2078_v36 = vor.u32 %v1908_v34, %v1800_v32  ;;  %v2092_v39 = vor.u32 %v1906_v37, %v1802_v38  ;;  %v1808_v40 = vld [vmem:[%s2037_s13 + $0x4] sm:$0xf]  ;;  %v1910_v41 = vld [vmem:[%s2037_s13 + $0x10] sm:$0xf0]  ;;  %v1816_v42 = vld [vmem:[%s2037_s13 + $0xc] sm:$0xf] }
  0x17   : > { %613 = vmatpush.bf16.msra.mxu2 %v1765_v28  ;;  %v1911_v43 = vld [vmem:[%s2037_s13 + $0x18] sm:$0xf0]  ;;  %v1809_v44 = vor.u32 %v1910_v41, %v1808_v40  ;;  %v1909_v46 = vld [vmem:[%s2037_s13 + $0x8] sm:$0xf]  ;;  %v1810_v47 = vld [vmem:[%s2037_s13 + $0x14] sm:$0xf0] }
  0x18   : > { %627 = vmatpush.bf16.msra.mxu3 %v1769_v29  ;;  %678 = vrot.lane.b32.xlu2 %v2078_v36, %s1961_s19  ;;  %v1817_v45 = vor.u32 %v1911_v43, %v1816_v42  ;;  %v1813_v48 = vor.u32 %v1909_v46, %v1810_v47  ;;  %v2132_v51 = vadd.s32 384, %v2126_v50  ;;  %v330_v52 = vadd.s32 256, %v2126_v50  ;;  %s1970_s9 = smov 19  }
  0x19   : > { %1786 = vmatmul.msk.bf16.vlgmr.msra.gmra.mxu0 %vm574_vm0, %v1896_v33  ;;  %1787 = vmatmul.msk.bf16.vlgmr.msra.gmra.mxu1 %vm574_vm0, %v1896_v33  ;;  %v379_v53 = vand.u32 65535, %v2126_v50  ;;  %v380_v56 = vshrl.u32 %v2126_v50, 16 }
  0x1a   : > { %1788 = vmatmul.msk.bf16.vlgmr.msra.gmra.mxu2 %vm574_vm0, %v1896_v33  ;;  %676 = vrot.lane.b32.xlu1 %v2076_v35, %s1961_s19  ;;  %v2138_v54 = vadd.s32 4294967168, %v2132_v51  ;;  %v2141_v55 = vadd.s32 4294967168, %v330_v52 }
  0x1b   : > { %1789 = vmatmul.msk.bf16.vlgmr.msra.gmra.mxu3 %vm574_vm0, %v1896_v33  ;;  %v383_v57 = vmul.u32 58254, %v379_v53  ;;  %v382_v60 = vmul.u32 14564, %v379_v53  ;;  %v384_v61 = vmul.u32 14564, %v380_v56  ;;  %v385_v10 = vmul.u32 58254, %v380_v56 }
  0x1c   : > { %v437_v58 = vand.u32 65535, %v2138_v54  ;;  %v408_v59 = vand.u32 65535, %v2141_v55  ;;  %v438_v63 = vshrl.u32 %v2138_v54, 16  ;;  %v409_v2 = vshrl.u32 %v2141_v55, 16 }
  0x1d   : > { %686 = vrot.lane.b32.xlu0 %v2050_v6, %s1962_s22  ;;  %v386_v62 = vshll.u32 %v383_v57, 16  ;;  %v388_v4 = vshll.u32 %v384_v61, 16  ;;  %v387_v24 = vshrl.u32 %v383_v57, 16  ;;  %v389_v30 = vshrl.u32 %v384_v61, 16 }
  0x1e   : > { %v441_v0 = vmul.u32 58254, %v437_v58  ;;  %v412_v3 = vmul.u32 58254, %v408_v59  ;;  %v440_v7 = vmul.u32 14564, %v437_v58  ;;  %v442_v8 = vmul.u32 14564, %v438_v63 }
  0x1f   : > { %vm390_vm1 = vc.u32 %v382_v60, %v386_v62  ;;  %v392_v5 = vadd.s32 %v386_v62, %v382_v60  ;;  %v411_v12 = vmul.u32 14564, %v408_v59  ;;  %v413_v13 = vmul.u32 14564, %v409_v2 }
  0x20   : > { %680 = vrot.lane.b32.xlu2 %v2092_v39, %s1961_s19  ;;  %v444_v9 = vshll.u32 %v441_v0, 16  ;;  %v391_v11 = vsel %vm390_vm1, 1, %v1960_v1  ;;  %v415_v14 = vshll.u32 %v412_v3, 16  ;;  %v446_v15 = vshll.u32 %v442_v8, 16 }
  0x21   : > { %vm394_vm2 = vc.u32 %v392_v5, %v388_v4  ;;  %v393_v17 = vadd.s32 %v391_v11, %v385_v10  ;;  %v443_v18 = vmul.u32 58254, %v438_v63  ;;  %v417_v20 = vshll.u32 %v413_v13, 16 }
  0x22   : > { %688 = vrot.lane.b32.xlu1 %v2076_v35, %s1962_s22  ;;  %vm448_vm3 = vc.u32 %v440_v7, %v444_v9  ;;  %v450_v16 = vadd.s32 %v444_v9, %v440_v7  ;;  %v395_v19 = vsel %vm394_vm2, 1, %v1960_v1  ;;  %vm419_vm4 = vc.u32 %v411_v12, %v415_v14 }
  0x23   : > { %v421_v21 = vadd.s32 %v415_v14, %v411_v12  ;;  %v449_v22 = vsel %vm448_vm3, 1, %v1960_v1  ;;  %v414_v23 = vmul.u32 58254, %v409_v2  ;;  %v397_v25 = vadd.s32 %v395_v19, %v393_v17 }
  0x24   : > { %vm452_vm5 = vc.u32 %v450_v16, %v446_v15  ;;  %v420_v26 = vsel %vm419_vm4, 1, %v1960_v1  ;;  %v451_v27 = vadd.s32 %v449_v22, %v443_v18  ;;  %v445_v33 = vshrl.u32 %v441_v0, 16 }
  0x25   : > { %692 = vrot.lane.b32.xlu0 %v2092_v39, %s1962_s22  ;;  %vm423_vm6 = vc.u32 %v421_v21, %v417_v20  ;;  %v453_v28 = vsel %vm452_vm5, 1, %v1960_v1  ;;  %v422_v29 = vadd.s32 %v420_v26, %v414_v23  ;;  %v398_v31 = vadd.s32 %v397_v25, %v387_v24 }
  0x26   : > { %v424_v32 = vsel %vm423_vm6, 1, %v1960_v1  ;;  %v455_v34 = vadd.s32 %v453_v28, %v451_v27  ;;  %v416_v37 = vshrl.u32 %v412_v3, 16  ;;  %v447_v42 = vshrl.u32 %v442_v8, 16 }
  0x27   : > { %v426_v38 = vadd.s32 %v424_v32, %v422_v29  ;;  %v399_v41 = vadd.s32 %v398_v31, %v389_v30  ;;  %v1969_v8 = vmov 0.0   ;;  %vm339_vm2 = vcmp.lt.s32.totalorder %v2132_v51, 416 }
  0x28   : > { %690 = vrot.lane.b32.xlu2 %v2078_v36, %s1962_s22  ;;  %v456_v43 = vadd.s32 %v455_v34, %v445_v33  ;;  %vm756_vm6 = vcmask 744448  }
  0x29   : > { %v400_v46 = vshrl.u32 %v399_v41, 4 }
  0x2a   : > { %698 = vrot.lane.b32.xlu1 %v2050_v6, %s1963_s23  ;;  %v457_v47 = vadd.s32 %v456_v43, %v447_v42 }
  0x2b   : > { %v401_v52 = vmul.u32 18, %v400_v46 }
  0x2c   : > { %v458_v53 = vshrl.u32 %v457_v47, 4 }
  0x2d   : > { %702 = vrot.lane.b32.xlu0 %v2078_v36, %s1963_s23  ;;  %v402_v57 = vsub.s32 %v2126_v50, %v401_v52 }
  0x2e   : > { %v459_v59 = vmul.u32 18, %v458_v53 }
  0x2f   : > { %vm464_vm7 = vcmp.ne.s32.totalorder %v402_v57, 0  ;;  %vm468_vm8 = vcmp.lt.s32.totalorder %v402_v57, 0  ;;  %v476_v0 = vadd.s32 18, %v402_v57 }
  0x30   : > { %700 = vrot.lane.b32.xlu2 %v2076_v35, %s1963_s23  ;;  %v460_v62 = vsub.s32 %v2138_v54, %v459_v59  ;;  %vm472_vm9 = vmand %vm468_vm8, %vm464_vm7  ;;  %vm747_vm7 = vcmask 752640   ;;  %vm738_vm8 = vcmask 883712  }
  0x31   : > { %v480_v50 = vsel %vm472_vm9, %v476_v0, %v402_v57  ;;  %vm729_vm9 = vcmask 891904  }
  0x32   : > { %750 = vrot.lane.b32.xlu1 %v1809_v44, %s1964_s24  ;;  %vm466_vm10 = vcmp.ne.s32.totalorder %v460_v62, 0  ;;  %vm470_vm11 = vcmp.lt.s32.totalorder %v460_v62, 0  ;;  %v478_v5 = vadd.s32 18, %v460_v62  ;;  %vm484_vm15 = vcmp.lt.s32.totalorder %v480_v50, 16 }
  0x33   : > { %vm474_vm14 = vmand %vm470_vm11, %vm466_vm10  ;;  %v2171_v9 = vsel %vm484_vm15, 1.0, %v1969_v8  ;;  %vm706_vm10 = vcmask 900096   ;;  %vm682_vm11 = vcmask 1039360   ;;  %vm1560_vm15 = vcmask 130048  }
  0x34   : > { %v482_v54 = vsel %vm474_vm14, %v478_v5, %v460_v62  ;;  %vm765_vm14 = vcmask 736256  }
  0x35   : > { %754 = vrot.lane.b32.xlu0 %v1817_v45, %s1964_s24  ;;  %vm486_vm3 = vcmp.lt.s32.totalorder %v482_v54, 16 }
  0x36   : > { %vm490_vm5 = vmand %vm339_vm2, %vm486_vm3  ;;  %vm1651_vm2 = vcmask 1041408  }
  0x37   : > { %v2183_v21 = vsel %vm490_vm5, 1.0, %v1969_v8  ;;  %vm1655_vm5 = vcmask 1045508  }
  0x38   : > { %752 = vrot.lane.b32.xlu2 %v1813_v48, %s1964_s24 }
  0x3a   : > { %741 = vrot.lane.b32.xlu1 %v1809_v44, %s1965_s25 }
  0x3d   : > { %745 = vrot.lane.b32.xlu0 %v1817_v45, %s1965_s25 }
  0x40   : > { %743 = vrot.lane.b32.xlu2 %v1813_v48, %s1965_s25 }
  0x42   : > { %732 = vrot.lane.b32.xlu1 %v1809_v44, %s1966_s26 }
  0x45   : > { %736 = vrot.lane.b32.xlu0 %v1817_v45, %s1966_s26 }
  0x48   : > { %734 = vrot.lane.b32.xlu2 %v1813_v48, %s1966_s26 }
  0x4a   : > { %723 = vrot.lane.b32.xlu1 %v1809_v44, %s1967_s29 }
  0x4d   : > { %727 = vrot.lane.b32.xlu0 %v1817_v45, %s1967_s29 }
  0x50   : > { %725 = vrot.lane.b32.xlu2 %v1813_v48, %s1967_s29 }
  0x52   : > { %704 = vrot.lane.b32.xlu1 %v2092_v39, %s1963_s23 }
  0x55   : > { %759 = vrot.lane.b32.xlu0 %v1809_v44, %s1968_s30  ;;  %v418_v44 = vshrl.u32 %v413_v13, 16 }
  0x58   : > { %763 = vrot.lane.b32.xlu2 %v1817_v45, %s1968_s30  ;;  %v427_v45 = vadd.s32 %v426_v38, %v416_v37 }
  0x5a   : > { %761 = vrot.lane.b32.xlu1 %v1813_v48, %s1968_s30  ;;  %v428_v49 = vadd.s32 %v427_v45, %v418_v44 }
  0x5c   : > { %v429_v1 = vshrl.u32 %v428_v49, 4 }
  0x5e   : > { %v430_v61 = vmul.u32 18, %v429_v1 }
  0x60   : > { %v431_v2 = vsub.s32 %v2141_v55, %v430_v61 }
  0x62   : > { %vm465_vm12 = vcmp.ne.s32.totalorder %v431_v2, 0  ;;  %vm469_vm13 = vcmp.lt.s32.totalorder %v431_v2, 0  ;;  %v477_v7 = vadd.s32 18, %v431_v2 }
  0x63   : > { %vm473_vm1 = vmand %vm469_vm13, %vm465_vm12  ;;  %vm694_vm12 = vcmask 1031168   ;;  %vm1053_vm13 = vcmask 154624  }
  0x64   : > { %v481_v55 = vsel %vm473_vm1, %v477_v7, %v431_v2  ;;  %vm1662_vm1 = vcmask 1043458  }
  0x65   : > { %vm485_vm4 = vcmp.lt.s32.totalorder %v481_v55, 16  ;;  %vm1663_vm3 = vmor %vm1662_vm1, %vm1651_vm2 }
  0x66   : > { %v2181_v20 = vsel %vm485_vm4, 1.0, %v1969_v8  ;;  %vm1664_vm4 = vcmask 259076  }
  0x72   : > { %v2154_v40 = vpop.permute.xlu2 %678 }
  0x7a   : > { %v2156_v56 = vpop.permute.xlu2 %680 }
  0x7f   : > { %v514_v48 = vpop.permute.xlu0 %513 }
  0x80   : > { %v521_v13 = vmul.f32 0.0, %v514_v48  ;;  %v522_v14 = vmul.f32 %v2171_v9, %v514_v48  ;;  %v523_v51 = vmul.f32 %v2181_v20, %v514_v48  ;;  %v524_v25 = vmul.f32 %v2183_v21, %v514_v48 }
  0x82   : > { %v2164_v63 = vpop.permute.xlu2 %690 }
  0x83   : > { %v2159_v58 = vpop.permute.xlu1 %674 }
  0x87   : > { %v2161_v60 = vpop.permute.xlu0 %518 }
  0x88   : > { %v525_v27 = vmul.f32 0.0, %v2161_v60  ;;  %v526_v31 = vmul.f32 %v2171_v9, %v2161_v60  ;;  %v527_v43 = vmul.f32 %v2181_v20, %v2161_v60  ;;  %v528_v45 = vmul.f32 %v2183_v21, %v2161_v60 }
  0x8a   : > { %v2173_v10 = vpop.permute.xlu2 %700 }
  0x8c   : > { %v2167_v3 = vpop.permute.xlu1 %676 }
  0x8f   : > { %v2169_v4 = vpop.permute.xlu0 %686 }
  0x92   : > { %v753_v23 = vpop.permute.xlu2 %752 }
  0x94   : > { %v2175_v11 = vpop.permute.xlu1 %688 }
  0x96   : > { %v587_v15 = vpop.f32.mrf.mxu0  ;;  %v601_v16 = vpop.f32.mrf.mxu1 }
  0x97   : > { %v2178_v12 = vpop.permute.xlu0 %692  ;;  %v588_v17 = vadd.f32 %v587_v15, %v521_v13  ;;  %v602_v18 = vadd.f32 %v601_v16, %v522_v14 }
  0x99   : > { %v634_v19 = vpack.c.bf16 %v602_v18, %v588_v17 }
  0x9a   : > { %v744_v53 = vpop.permute.xlu2 %743 }
  0x9b   : > { %638 = vst [vmem:[#allocation2] sm:$0xff] %v634_v19 }
  0x9c   : > { %v2185_v22 = vpop.permute.xlu1 %698 }
  0x9d   : > { %v615_v24 = vpop.f32.mrf.mxu2 }
  0x9e   : > { %v616_v28 = vadd.f32 %v615_v24, %v523_v51  ;;  %v629_v29 = vpop.f32.mrf.mxu3  ;;  %v589_v30 = vpop.f32.mrf.mxu0 }
  0x9f   : > { %v2189_v26 = vpop.permute.xlu0 %702  ;;  %v630_v32 = vadd.f32 %v629_v29, %v524_v25  ;;  %v590_v33 = vadd.f32 %v589_v30, %v525_v27  ;;  %v603_v34 = vpop.f32.mrf.mxu1 }
  0xa0   : > { %v604_v37 = vadd.f32 %v603_v34, %v526_v31  ;;  %v708_v18 = vsel %vm706_vm10, %v2173_v10, %v2189_v26 }
  0xa1   : > { %v635_v38 = vpack.c.bf16 %v630_v32, %v616_v28 }
  0xa2   : > { %v636_v41 = vpack.c.bf16 %v604_v37, %v590_v33  ;;  %v735_v0 = vpop.permute.xlu2 %734  ;;  %v1836_v13 = vld [vmem:[#allocation2 + $0x4] sm:$0xf]  ;;  %v1820_v25 = vld [vmem:[#allocation2] sm:$0xf] }
  0xa3   : > { %639 = vst [vmem:[#allocation2 + $0x8] sm:$0xff] %v635_v38  ;;  %v1912_v51 = vld [vmem:[#allocation2 + $0x4] sm:$0xf] }
  0xa4   : > { %640 = vst [vmem:[#allocation2 + $0x10] sm:$0xff] %v636_v41  ;;  %v2194_v42 = vpop.permute.xlu1 %750 }
  0xa5   : > { %v617_v44 = vpop.f32.mrf.mxu2  ;;  %v757_v47 = vsel %vm756_vm6, %v2194_v42, %v753_v23 }
  0xa6   : > { %v618_v48 = vadd.f32 %v617_v44, %v527_v43  ;;  %v631_v49 = vpop.f32.mrf.mxu3  ;;  %967 = vrot.lane.b32.xlu1 %v757_v47, %s1970_s9 }
  0xa7   : > { %v2200_v46 = vpop.permute.xlu0 %754  ;;  %v632_v1 = vadd.f32 %v631_v49, %v528_v45 }
  0xa8   : > { %v758_v52 = vsel %vm756_vm6, %v753_v23, %v2200_v46 }
  0xa9   : > { %969 = vrot.lane.b32.xlu2 %v758_v52, %s1970_s9  ;;  %v637_v57 = vpack.c.bf16 %v632_v1, %v618_v48  ;;  %v697_v1 = vsel %vm694_vm12, %v2164_v63, %v2178_v12 }
  0xaa   : > { %v726_v54 = vpop.permute.xlu2 %725  ;;  %v1916_v30 = vld [vmem:[#allocation2 + $0x8] sm:$0xf]  ;;  %v1844_v32 = vld [vmem:[#allocation2 + $0xc] sm:$0xf] }
  0xab   : > { %641 = vst [vmem:[#allocation2 + $0x18] sm:$0xff] %v637_v57  ;;  %v1917_v8 = vld [vmem:[#allocation2 + $0x10] sm:$0xf0]  ;;  %v1914_v24 = vld [vmem:[#allocation2 + $0xc] sm:$0xf0] }
  0xac   : > { %v2208_v59 = vpop.permute.xlu1 %741  ;;  %v1837_v16 = vor.u32 %v1917_v8, %v1836_v13  ;;  %v1822_v19 = vld [vmem:[#allocation2 + $0x10] sm:$0xf0]  ;;  %v2252_v27 = vor.u32 %v1914_v24, %v1820_v25  ;;  %v1828_v37 = vld [vmem:[#allocation2 + $0x8] sm:$0xf]  ;;  %v1913_v44 = vld [vmem:[#allocation2 + $0xc] sm:$0xf] }
  0xad   : > { %v748_v61 = vsel %vm747_vm7, %v2208_v59, %v744_v53  ;;  %v2245_v23 = vor.u32 %v1912_v51, %v1822_v19 }
  0xae   : > { %959 = vrot.lane.b32.xlu1 %v748_v61, %s1970_s9 }
  0xaf   : > { %v2210_v60 = vpop.permute.xlu0 %745 }
  0xb0   : > { %v749_v62 = vsel %vm747_vm7, %v744_v53, %v2210_v60  ;;  %v696_v53 = vsel %vm694_vm12, %v2175_v11, %v2164_v63 }
  0xb1   : > { %961 = vrot.lane.b32.xlu2 %v749_v62, %s1970_s9 }
  0xb2   : > { %v1838_v28 = vld [vmem:[#allocation2 + $0x14] sm:$0xf0]  ;;  %v1918_v29 = vld [vmem:[#allocation2 + $0x18] sm:$0xf0]  ;;  %v2276_v43 = vpop.permute.xlu2 %763 }
  0xb3   : > { %v1841_v31 = vor.u32 %v1916_v30, %v1838_v28  ;;  %v1845_v33 = vor.u32 %v1918_v29, %v1844_v32  ;;  %v1915_v34 = vld [vmem:[#allocation2 + $0x14] sm:$0xf0]  ;;  %v1830_v41 = vld [vmem:[#allocation2 + $0x18] sm:$0xf0] }
  0xb4   : > { %v2218_v2 = vpop.permute.xlu1 %732  ;;  %v2267_v38 = vor.u32 %v1915_v34, %v1828_v37  ;;  %v2278_v45 = vor.u32 %v1913_v44, %v1830_v41 }
  0xb5   : > { %v739_v5 = vsel %vm738_vm8, %v2218_v2, %v735_v0 }
  0xb6   : > { %951 = vrot.lane.b32.xlu0 %v739_v5, %s1970_s9 }
  0xb7   : > { %v2220_v50 = vpop.permute.xlu0 %736 }
  0xb8   : > { %v740_v7 = vsel %vm738_vm8, %v735_v0, %v2220_v50 }
  0xb9   : > { %953 = vrot.lane.b32.xlu1 %v740_v7, %s1970_s9 }
  0xbc   : > { %v2228_v55 = vpop.permute.xlu1 %723 }
  0xbd   : > { %v730_v15 = vsel %vm729_vm9, %v2228_v55, %v726_v54 }
  0xbe   : > { %943 = vrot.lane.b32.xlu2 %v730_v15, %s1970_s9 }
  0xbf   : > { %v2230_v14 = vpop.permute.xlu0 %727 }
  0xc0   : > { %v731_v17 = vsel %vm729_vm9, %v726_v54, %v2230_v14 }
  0xc1   : > { %945 = vrot.lane.b32.xlu0 %v731_v17, %s1970_s9  ;;  %854 = vrot.lane.b32.xlu1 %v1837_v16, %s1961_s19 }
  0xc4   : > { %v2286_v47 = vpop.permute.xlu1 %704 }
  0xc5   : > { %v709_v49 = vsel %vm706_vm10, %v2189_v26, %v2286_v47 }
  0xc6   : > { %838 = vrot.lane.b32.xlu2 %v1837_v16, %s1966_s26 }
  0xc7   : > { %v2325_v0 = vpop.permute.xlu0 %759 }
  0xc9   : > { %935 = vrot.lane.b32.xlu0 %v708_v18, %s1970_s9  ;;  %846 = vrot.lane.b32.xlu1 %v1837_v16, %s1965_s25 }
  0xcc   : > { %v2303_v52 = vpop.permute.xlu1 %761 }
  0xce   : > { %830 = vrot.lane.b32.xlu2 %v1837_v16, %s1967_s29 }
  0xd1   : > { %797 = vrot.lane.b32.xlu0 %v2245_v23, %s1962_s22  ;;  %808 = vrot.lane.b32.xlu1 %v2245_v23, %s1963_s23 }
  0xd6   : > { %784 = vrot.lane.b32.xlu2 %v2252_v27, %s1961_s19 }
  0xd9   : > { %806 = vrot.lane.b32.xlu0 %v2252_v27, %s1963_s23  ;;  %862 = vrot.lane.b32.xlu1 %v1837_v16, %s1964_s24 }
  0xde   : > { %856 = vrot.lane.b32.xlu2 %v1841_v31, %s1961_s19 }
  0xe1   : > { %858 = vrot.lane.b32.xlu0 %v1845_v33, %s1961_s19  ;;  %786 = vrot.lane.b32.xlu1 %v2245_v23, %s1961_s19 }
  0xe6   : > { %848 = vrot.lane.b32.xlu2 %v1841_v31, %s1965_s25 }
  0xe9   : > { %850 = vrot.lane.b32.xlu0 %v1845_v33, %s1965_s25  ;;  %795 = vrot.lane.b32.xlu1 %v2252_v27, %s1962_s22 }
  0xee   : > { %810 = vrot.lane.b32.xlu2 %v2267_v38, %s1963_s23 }
  0xf1   : > { %840 = vrot.lane.b32.xlu0 %v1841_v31, %s1966_s26  ;;  %842 = vrot.lane.b32.xlu1 %v1845_v33, %s1966_s26 }
  0xf6   : > { %864 = vrot.lane.b32.xlu2 %v1841_v31, %s1964_s24 }
  0xf9   : > { %832 = vrot.lane.b32.xlu0 %v1841_v31, %s1967_s29  ;;  %834 = vrot.lane.b32.xlu1 %v1845_v33, %s1967_s29 }
  0xfe   : > { %965 = vrot.lane.b32.xlu2 %v2194_v42, %s1970_s9  ;;  %v684_v42 = vsel %vm682_vm11, %v2167_v3, %v2154_v40 }
 0x101   : > { %812 = vrot.lane.b32.xlu0 %v2278_v45, %s1963_s23  ;;  %799 = vrot.lane.b32.xlu1 %v2267_v38, %s1962_s22 }
 0x103   : > { %v2288_v48 = vpop.permute.xlu2 %969 }
 0x106   : > { %801 = vrot.lane.b32.xlu2 %v2278_v45, %s1962_s22 }
 0x109   : > { %790 = vrot.lane.b32.xlu0 %v2278_v45, %s1961_s19  ;;  %937 = vrot.lane.b32.xlu1 %v709_v49, %s1970_s9 }
 0x10b   : > { %v2307_v26 = vpop.permute.xlu2 %961 }
 0x10e   : > { %788 = vrot.lane.b32.xlu2 %v2267_v38, %s1961_s19 }
 0x111   : > { %866 = vrot.lane.b32.xlu0 %v1845_v33, %s1964_s24  ;;  %919 = vrot.lane.b32.xlu1 %v684_v42, %s1970_s9 }
 0x116   : > { %927 = vrot.lane.b32.xlu2 %v696_v53, %s1970_s9 }
 0x118   : > { %v2319_v57 = vpop.permute.xlu2 %943  ;;  %v968_v61 = vpop.permute.xlu1 %967 }
 0x119   : > { %929 = vrot.lane.b32.xlu0 %v697_v1, %s1970_s9  ;;  %949 = vrot.lane.b32.xlu1 %v2218_v2, %s1970_s9  ;;  %v1076_v62 = vsel %vm1053_vm13, %v968_v61, %v2288_v48 }
 0x11a   : > { %1207 = vmatpush.bf16.msrb.mxu3 %v1076_v62 }
 0x11e   : > { %957 = vrot.lane.b32.xlu2 %v2208_v59, %s1970_s9  ;;  %v685_v59 = vsel %vm682_vm11, %v2154_v40, %v2156_v56 }
 0x120   : > { %v2331_v63 = vpop.permute.xlu1 %959  ;;  %v839_v2 = vpop.permute.xlu2 %838 }
 0x121   : > { %911 = vrot.lane.b32.xlu0 %v2076_v35, %s1970_s9  ;;  %913 = vrot.lane.b32.xlu1 %v2078_v36, %s1970_s9  ;;  %v1073_v5 = vsel %vm1053_vm13, %v2331_v63, %v2307_v26  ;;  %v707_v35 = vsel %vm706_vm10, %v2185_v22, %v2173_v10  ;;  %v695_v10 = vsel %vm694_vm12, %v2169_v4, %v2175_v11 }
 0x122   : > { %1208 = vmatpush.bf16.msrb.mxu3 %v1073_v5 }
 0x126   : > { %921 = vrot.lane.b32.xlu2 %v685_v59, %s1970_s9 }
 0x128   : > { %v831_v36 = vpop.permute.xlu2 %830  ;;  %v2346_v7 = vpop.permute.xlu0 %951 }
 0x129   : > { %941 = vrot.lane.b32.xlu0 %v2228_v55, %s1970_s9  ;;  %933 = vrot.lane.b32.xlu1 %v707_v35, %s1970_s9 }
 0x12b   : > { %v2348_v54 = vpop.permute.xlu1 %953 }
 0x12c   : > { %v1070_v40 = vsel %vm1053_vm13, %v2346_v7, %v2348_v54 }
 0x12d   : > { %1209 = vmatpush.bf16.msrb.mxu3 %v1070_v40 }
 0x12e   : > { %983 = vrot.lane.b32.xlu2 %v2245_v23, %s1970_s9 }
 0x130   : > { %v785_v22 = vpop.permute.xlu2 %784 }
 0x131   : > { %925 = vrot.lane.b32.xlu0 %v695_v10, %s1970_s9  ;;  %971 = vrot.lane.b32.xlu1 %v2200_v46, %s1970_s9 }
 0x133   : > { %v2361_v8 = vpop.permute.xlu0 %945  ;;  %v855_v55 = vpop.permute.xlu1 %854 }
 0x134   : > { %v1067_v13 = vsel %vm1053_vm13, %v2319_v57, %v2361_v8 }
 0x135   : > { %1210 = vmatpush.bf16.msrb.mxu3 %v1067_v13 }
 0x136   : > { %1013 = vrot.lane.b32.xlu2 %v831_v36, %s1970_s9 }
 0x138   : > { %v857_v4 = vpop.permute.xlu2 %856 }
 0x139   : > { %985 = vrot.lane.b32.xlu0 %v2267_v38, %s1970_s9 }
 0x13b   : > { %v2369_v11 = vpop.permute.xlu0 %935  ;;  %v847_v15 = vpop.permute.xlu1 %846 }
 0x13c   : > { %1029 = vrot.lane.b32.xlu1 %v847_v15, %s1970_s9 }
 0x140   : > { %v849_v46 = vpop.permute.xlu2 %848 }
 0x141   : > { %1021 = vrot.lane.b32.xlu0 %v839_v2, %s1970_s9 }
 0x143   : > { %v2373_v16 = vpop.permute.xlu0 %797  ;;  %v809_v17 = vpop.permute.xlu1 %808 }
 0x148   : > { %v811_v18 = vpop.permute.xlu2 %810 }
 0x14b   : > { %v807_v19 = vpop.permute.xlu0 %806  ;;  %v2375_v51 = vpop.permute.xlu1 %862 }
 0x14c   : > { %1037 = vrot.lane.b32.xlu1 %v2375_v51, %s1970_s9  ;;  %v814_v23 = vsel %vm706_vm10, %v807_v19, %v809_v17  ;;  %v815_v19 = vsel %vm706_vm10, %v809_v17, %v811_v18 }
 0x14d   : > { %1005 = vrot.lane.b32.xlu0 %v814_v23, %s1970_s9 }
 0x150   : > { %v2381_v24 = vpop.permute.xlu2 %864 }
 0x153   : > { %v859_v25 = vpop.permute.xlu0 %858  ;;  %v2383_v28 = vpop.permute.xlu1 %786 }
 0x154   : > { %v861_v33 = vsel %vm682_vm11, %v857_v4, %v859_v25  ;;  %v792_v49 = vsel %vm682_vm11, %v785_v22, %v2383_v28 }
 0x155   : > { %872 = vrot.lane.b32.xlu0 %v859_v25, %s1964_s24 }
 0x158   : > { %v966_v29 = vpop.permute.xlu2 %965 }
 0x159   : > { %v1075_v32 = vsel %vm1053_vm13, %v966_v29, %v968_v61  ;;  %v852_v61 = vsel %vm747_vm7, %v847_v15, %v849_v46 }
 0x15a   : > { %1165 = vmatpush.bf16.msrb.mxu0 %v1075_v32 }
 0x15b   : > { %v851_v30 = vpop.permute.xlu0 %850  ;;  %v796_v31 = vpop.permute.xlu1 %795 }
 0x15c   : > { %1035 = vrot.lane.b32.xlu1 %v851_v30, %s1970_s9  ;;  %v803_v34 = vsel %vm694_vm12, %v796_v31, %v2373_v16  ;;  %v853_v22 = vsel %vm747_vm7, %v849_v46, %v851_v30  ;;  %v766_v46 = vsel %vm765_vm14, %v2325_v0, %v2303_v52 }
 0x15d   : > { %870 = vrot.lane.b32.xlu0 %v861_v33, %s1964_s24  ;;  %997 = vrot.lane.b32.xlu2 %v803_v34, %s1970_s9 }
 0x160   : > { %v2393_v37 = vpop.permute.xlu2 %801 }
 0x163   : > { %v841_v38 = vpop.permute.xlu0 %840  ;;  %v843_v41 = vpop.permute.xlu1 %842 }
 0x164   : > { %1027 = vrot.lane.b32.xlu1 %v843_v41, %s1970_s9  ;;  %v844_v44 = vsel %vm738_vm8, %v839_v2, %v841_v38  ;;  %v860_v2 = vsel %vm682_vm11, %v855_v55, %v857_v4  ;;  %v845_v40 = vsel %vm738_vm8, %v841_v38, %v843_v41 }
 0x165   : > { %1023 = vrot.lane.b32.xlu0 %v844_v44, %s1970_s9  ;;  %989 = vrot.lane.b32.xlu2 %v792_v49, %s1970_s9 }
 0x168   : > { %v2401_v42 = vpop.permute.xlu2 %788 }
 0x16b   : > { %v833_v53 = vpop.permute.xlu0 %832  ;;  %v2403_v1 = vpop.permute.xlu1 %834 }
 0x16c   : > { %1031 = vrot.lane.b32.xlu1 %v852_v61, %s1970_s9  ;;  %v836_v62 = vsel %vm729_vm9, %v831_v36, %v833_v53  ;;  %v837_v15 = vsel %vm729_vm9, %v833_v53, %v2403_v1 }
 0x16d   : > { %1015 = vrot.lane.b32.xlu0 %v836_v62, %s1970_s9  ;;  %868 = vrot.lane.b32.xlu2 %v860_v2, %s1964_s24 }
 0x170   : > { %v2411_v5 = vpop.permute.xlu2 %927 }
 0x173   : > { %v813_v59 = vpop.permute.xlu0 %812  ;;  %v800_v35 = vpop.permute.xlu1 %799 }
 0x174   : > { %1025 = vrot.lane.b32.xlu1 %v845_v40, %s1970_s9  ;;  %v816_v10 = vsel %vm706_vm10, %v811_v18, %v813_v59  ;;  %v804_v29 = vsel %vm694_vm12, %v2373_v16, %v800_v35  ;;  %v874_v18 = vsel %vm756_vm6, %v2375_v51, %v2381_v24  ;;  %v683_v16 = vsel %vm682_vm11, %v2159_v58, %v2167_v3 }
 0x175   : > { %1009 = vrot.lane.b32.xlu0 %v816_v10, %s1970_s9  ;;  %1033 = vrot.lane.b32.xlu2 %v853_v22, %s1970_s9  ;;  %v1924_v22 = vld [vmem:[#allocation2 + $0xc] sm:$0xf0] }
 0x178   : > { %v958_v36 = vpop.permute.xlu2 %957 }
 0x179   : > { %v1072_v4 = vsel %vm1053_vm13, %v958_v36, %v2331_v63 }
 0x17a   : > { %1166 = vmatpush.bf16.msrb.mxu0 %v1072_v4 }
 0x17b   : > { %v2419_v55 = vpop.permute.xlu0 %790  ;;  %v2421_v13 = vpop.permute.xlu1 %937 }
 0x17c   : > { %1017 = vrot.lane.b32.xlu1 %v837_v15, %s1970_s9  ;;  %v1064_v23 = vsel %vm1053_vm13, %v2369_v11, %v2421_v13  ;;  %v794_v17 = vsel %vm682_vm11, %v2401_v42, %v2419_v55 }
 0x17d   : > { %975 = vrot.lane.b32.xlu0 %v766_v46, %s1970_s9  ;;  %1007 = vrot.lane.b32.xlu2 %v815_v19, %s1970_s9 }
 0x17e   : > { %1211 = vmatpush.bf16.msrb.mxu3 %v1064_v23  ;;  %v1848_v23 = vld [vmem:[%s2871_s4] sm:$0xf] }
 0x180   : > { %v2465_v33 = vpop.permute.xlu2 %921 }
 0x183   : > { %v867_v63 = vpop.permute.xlu0 %866  ;;  %v2437_v25 = vpop.permute.xlu1 %919 }
 0x184   : > { %999 = vrot.lane.b32.xlu1 %v804_v29, %s1970_s9  ;;  %v1058_v58 = vsel %vm1053_vm13, %v2437_v25, %v2465_v33  ;;  %v875_v41 = vsel %vm756_vm6, %v2381_v24, %v867_v63 }
 0x185   : > { %993 = vrot.lane.b32.xlu0 %v794_v17, %s1970_s9  ;;  %1039 = vrot.lane.b32.xlu2 %v874_v18, %s1970_s9 }
 0x188   : > { %v2498_v62 = vpop.permute.xlu2 %983 }
 0x18b   : > { %v2450_v30 = vpop.permute.xlu0 %929  ;;  %v950_v31 = vpop.permute.xlu1 %949 }
 0x18c   : > { %917 = vrot.lane.b32.xlu1 %v683_v16, %s1970_s9  ;;  %v1069_v32 = vsel %vm1053_vm13, %v950_v31, %v2346_v7  ;;  %v1061_v51 = vsel %vm1053_vm13, %v2411_v5, %v2450_v30 }
 0x18d   : > { %981 = vrot.lane.b32.xlu0 %v2252_v27, %s1970_s9  ;;  %963 = vrot.lane.b32.xlu2 %v2210_v60, %s1970_s9  ;;  %v767_v27 = vsel %vm765_vm14, %v2303_v52, %v2276_v43  ;;  %v805_v60 = vsel %vm694_vm12, %v800_v35, %v2393_v37  ;;  %v793_v52 = vsel %vm682_vm11, %v2383_v28, %v2401_v42 }
 0x18e   : > { %1167 = vmatpush.bf16.msrb.mxu0 %v1069_v32  ;;  %1212 = vmatpush.bf16.msrb.mxu3 %v1061_v51 }
 0x190   : > { %v1014_v28 = vpop.permute.xlu2 %1013 }
 0x192   : > { %1213 = vmatpush.bf16.msrb.mxu3 %v1058_v58 }
 0x193   : > { %v2470_v3 = vpop.permute.xlu0 %911  ;;  %v2472_v7 = vpop.permute.xlu1 %913 }
 0x194   : > { %977 = vrot.lane.b32.xlu1 %v767_v27, %s1970_s9  ;;  %v1055_v34 = vsel %vm1053_vm13, %v2470_v3, %v2472_v7 }
 0x195   : > { %1001 = vrot.lane.b32.xlu2 %v805_v60, %s1970_s9 }
 0x196   : > { %1214 = vmatpush.bf16.msrb.mxu3 %v1055_v34 }
 0x19b   : > { %v942_v38 = vpop.permute.xlu0 %941  ;;  %v934_v49 = vpop.permute.xlu1 %933 }
 0x19c   : > { %1041 = vrot.lane.b32.xlu1 %v875_v41, %s1970_s9  ;;  %v1066_v44 = vsel %vm1053_vm13, %v942_v38, %v2319_v57  ;;  %v1063_v53 = vsel %vm1053_vm13, %v934_v49, %v2369_v11 }
 0x19d   : > { %991 = vrot.lane.b32.xlu2 %v793_v52, %s1970_s9  ;;  %1168 = vmatpush.bf16.msrb.mxu0 %v1066_v44 }
 0x1a1   : > { %1169 = vmatpush.bf16.msrb.mxu0 %v1063_v53 }
 0x1a3   : > { %v926_v61 = vpop.permute.xlu0 %925  ;;  %v2506_v11 = vpop.permute.xlu1 %971 }
 0x1a4   : > { %1011 = vrot.lane.b32.xlu1 %v813_v59, %s1970_s9  ;;  %v1060_v24 = vsel %vm1053_vm13, %v926_v61, %v2411_v5 }
 0x1a5   : > { %1170 = vmatpush.bf16.msrb.mxu0 %v1060_v24 }
 0x1ab   : > { %v2502_v57 = vpop.permute.xlu0 %985 }
 0x1ac   : > { %1003 = vrot.lane.b32.xlu1 %v2393_v37, %s1970_s9 }
 0x1ae   : > { %v1030_v5 = vpop.permute.xlu1 %1029 }
 0x1b3   : > { %v1022_v42 = vpop.permute.xlu0 %1021 }
 0x1b4   : > { %931 = vrot.lane.b32.xlu1 %v2178_v12, %s1970_s9  ;;  %v1863_v12 = vld [vmem:[#allocation2] sm:$0xf] }
 0x1b5   : > { %v2518_v36 = vor.u32 %v1924_v22, %v1863_v12  ;;  %v1850_v12 = vld [vmem:[%s2871_s4 + $0xc] sm:$0xf0] }
 0x1b7   : > { %v2508_v2 = vpop.permute.xlu2 %997 }
 0x1bc   : > { %979 = vrot.lane.b32.xlu1 %v2276_v43, %s1970_s9 }
 0x1be   : > { %v1038_v37 = vpop.permute.xlu1 %1037 }
 0x1bf   : > { %v1006_v59 = vpop.permute.xlu0 %1005  ;;  %v2512_v35 = vpop.permute.xlu2 %989 }
 0x1c4   : > { %1043 = vrot.lane.b32.xlu1 %v867_v63, %s1970_s9  ;;  %v1920_v63 = vld [vmem:[%s2871_s4 + $0x8] sm:$0xf0] }
 0x1c5   : > { %v2535_v29 = vor.u32 %v1920_v63, %v1848_v23 }
 0x1c7   : > { %v2515_v40 = vpop.permute.xlu0 %872  ;;  %v869_v10 = vpop.permute.xlu2 %868  ;;  %1215 = vmatmul.bf16.vlgmr.msrb.gmra.mxu3 %v2535_v29 }
 0x1c8   : > { %1045 = vrot.lane.b32.xlu2 %v869_v10, %s1970_s9 }
 0x1cc   : > { %1336 = vrot.lane.b32.xlu1 %v2518_v36, %s1961_s19 }
 0x1ce   : > { %v1036_v43 = vpop.permute.xlu1 %1035 }
 0x1cf   : > { %v871_v4 = vpop.permute.xlu0 %870  ;;  %v1034_v15 = vpop.permute.xlu2 %1033 }
 0x1d0   : > { %v2523_v46 = vsel %vm1053_vm13, %v1034_v15, %v1036_v43  ;;  %1019 = vrot.lane.b32.xlu2 %v2403_v1, %s1970_s9  ;;  %v876_v19 = vsel %vm756_vm6, %v869_v10, %v871_v4  ;;  %v877_v27 = vsel %vm756_vm6, %v871_v4, %v2515_v40 }
 0x1d1   : > { %1047 = vrot.lane.b32.xlu0 %v876_v19, %s1970_s9 }
 0x1d4   : > { %1434 = vrot.lane.b32.xlu1 %v2518_v36, %s1970_s9 }
 0x1d6   : > { %v1028_v1 = vpop.permute.xlu1 %1027 }
 0x1d7   : > { %v1024_v17 = vpop.permute.xlu0 %1023  ;;  %v1008_v18 = vpop.permute.xlu2 %1007 }
 0x1d8   : > { %909 = vrot.lane.b32.xlu2 %v2050_v6, %s1970_s9  ;;  %v1090_v49 = vsel %vm1053_vm13, %v1006_v59, %v1008_v18 }
 0x1d9   : > { %955 = vrot.lane.b32.xlu0 %v2220_v50, %s1970_s9  ;;  %v1096_v50 = vsel %vm1053_vm13, %v1022_v42, %v1024_v17 }
 0x1de   : > { %v1032_v31 = vpop.permute.xlu1 %1031 }
 0x1df   : > { %v2545_v16 = vsel %vm1053_vm13, %v1032_v31, %v1034_v15  ;;  %v1016_v32 = vpop.permute.xlu0 %1015  ;;  %v2547_v51 = vpop.permute.xlu2 %1039  ;;  %v1099_v58 = vsel %vm1053_vm13, %v1030_v5, %v1032_v31 }
 0x1e0   : > { %973 = vrot.lane.b32.xlu2 %v2325_v0, %s1970_s9  ;;  %1179 = vmatpush.bf16.msrb.mxu1 %v1099_v58  ;;  %v2556_v6 = vsel %vm1053_vm13, %v1038_v37, %v2547_v51  ;;  %v1093_v41 = vsel %vm1053_vm13, %v1014_v28, %v1016_v32 }
 0x1e1   : > { %1049 = vrot.lane.b32.xlu0 %v877_v27, %s1970_s9 }
 0x1e4   : > { %1180 = vmatpush.bf16.msrb.mxu1 %v1096_v50 }
 0x1e6   : > { %v1026_v60 = vpop.permute.xlu1 %1025 }
 0x1e7   : > { %v2560_v34 = vpop.permute.xlu0 %1009  ;;  %v964_v38 = vpop.permute.xlu2 %963  ;;  %v2564_v0 = vsel %vm1053_vm13, %v1024_v17, %v1026_v60  ;;  %v2567_v52 = vsel %vm1053_vm13, %v1026_v60, %v1028_v1  ;;  %v1856_v17 = vld [vmem:[%s2871_s4 + $0x8] sm:$0xf]  ;;  %v882_v60 = vld [vmem:[%s2872_s5] sm:$0xff] }
 0x1e8   : > { %939 = vrot.lane.b32.xlu2 %v2286_v47, %s1970_s9  ;;  %1181 = vmatpush.bf16.msrb.mxu1 %v1093_v41  ;;  %v2573_v44 = vsel %vm1053_vm13, %v1008_v18, %v2560_v34  ;;  %v1074_v19 = vsel %vm1053_vm13, %v2307_v26, %v964_v38  ;;  %v1082_v38 = vsel %vm1053_vm13, %v2498_v62, %v2502_v57 }
 0x1e9   : > { %947 = vrot.lane.b32.xlu0 %v2230_v14, %s1970_s9 }
 0x1ec   : > { %1182 = vmatpush.bf16.msrb.mxu1 %v1090_v49 }
 0x1ee   : > { %v2578_v53 = vpop.permute.xlu1 %1017 }
 0x1ef   : > { %v2580_v61 = vpop.permute.xlu0 %975  ;;  %v2582_v24 = vpop.permute.xlu2 %1001  ;;  %v1094_v47 = vsel %vm1053_vm13, %v1016_v32, %v2578_v53 }
 0x1f0   : > { %987 = vrot.lane.b32.xlu2 %v2278_v45, %s1970_s9 }
 0x1f1   : > { %995 = vrot.lane.b32.xlu0 %v2419_v55, %s1970_s9 }
 0x1f6   : > { %v1000_v28 = vpop.permute.xlu1 %999 }
 0x1f7   : > { %v2590_v14 = vpop.permute.xlu0 %993  ;;  %v1087_v42 = vsel %vm1053_vm13, %v2508_v2, %v1000_v28  ;;  %v1088_v5 = vsel %vm1053_vm13, %v1000_v28, %v2582_v24  ;;  %v2596_v59 = vpop.permute.xlu2 %991 }
 0x1f8   : > { %915 = vrot.lane.b32.xlu2 %v2092_v39, %s1970_s9  ;;  %1183 = vmatpush.bf16.msrb.mxu1 %v1087_v42  ;;  %v1084_v45 = vsel %vm1053_vm13, %v2512_v35, %v2596_v59  ;;  %v883_v39 = vld [vmem:[%s2872_s5 + $0x8] sm:$0xff] }
 0x1f9   : > { %923 = vrot.lane.b32.xlu0 %v2156_v56, %s1970_s9 }
 0x1fc   : > { %1184 = vmatpush.bf16.msrb.mxu1 %v1084_v45 }
 0x1fe   : > { %v918_v55 = vpop.permute.xlu1 %917 }
 0x1ff   : > { %v982_v37 = vpop.permute.xlu0 %981  ;;  %v1057_v2 = vsel %vm1053_vm13, %v918_v55, %v2437_v25 }
 0x200   : > { %1171 = vmatpush.bf16.msrb.mxu0 %v1057_v2  ;;  %v1081_v10 = vsel %vm1053_vm13, %v982_v37, %v2498_v62  ;;  %886 = vperm.xlu2 %1950, %v882_v60  }
 0x201   : > { %1051 = vrot.lane.b32.xlu0 %v2515_v40, %s1970_s9  ;;  %1185 = vmatpush.bf16.msrb.mxu1 %v1081_v10  ;;  %v1919_v40 = vld [vmem:[%s2871_s4 + $0x4] sm:$0xf] }
 0x202   : > { %v2631_v15 = vor.u32 %v1919_v40, %v1850_v12 }
 0x206   : > { %v2627_v43 = vpop.permute.xlu1 %977 }
 0x209   : > { %891 = vperm.xlu0 %1949, %v883_v39  }
 0x20e   : > { %v2639_v23 = vpop.permute.xlu1 %1041 }
 0x211   : > { %1358 = vrot.lane.b32.xlu0 %v2518_v36, %s1963_s23 }
 0x216   : > { %v1012_v31 = vpop.permute.xlu1 %1011 }
 0x219   : > { %1347 = vrot.lane.b32.xlu0 %v2518_v36, %s1962_s22 }
 0x21e   : > { %v1004_v27 = vpop.permute.xlu1 %1003 }
 0x21f   : > { %v1089_v62 = vsel %vm1053_vm13, %v2582_v24, %v1004_v27 }
 0x222   : > { %v1046_v56 = vpop.permute.xlu2 %1045 }
 0x22a   : > { %v1020_v25 = vpop.permute.xlu2 %1019 }
 0x22b   : > { %v1095_v41 = vsel %vm1053_vm13, %v2578_v53, %v1020_v25 }
 0x232   : > { %v910_v35 = vpop.permute.xlu2 %909 }
 0x233   : > { %v1054_v22 = vsel %vm1053_vm13, %v910_v35, %v2470_v3  ;;  %v1077_v3 = vsel %vm1053_vm13, %v2288_v48, %v2506_v11  ;;  %v1921_v48 = vld [vmem:[%s2871_s4 + $0x10] sm:$0xf0] }
 0x234   : > { %1172 = vmatpush.bf16.msrb.mxu0 %v1054_v22  ;;  %v2648_v11 = vor.u32 %v1921_v48, %v1856_v17 }
 0x237   : > { %1173 = vmatmul.bf16.vlgmr.msrb.gmra.mxu0 %v2535_v29 }
 0x23a   : > { %v974_v36 = vpop.permute.xlu2 %973 }
 0x23b   : > { %v1078_v4 = vsel %vm1053_vm13, %v974_v36, %v2580_v61 }
 0x23c   : > { %1186 = vmatpush.bf16.msrb.mxu1 %v1078_v4 }
 0x23f   : > { %1187 = vmatmul.bf16.vlgmr.msrb.gmra.mxu1 %v2631_v15 }
 0x240   : > { %1249 = vmatpush.bf16.msra.mxu1 %v1077_v3 }
 0x243   : > { %v1048_v63 = vpop.permute.xlu0 %1047 }
 0x244   : > { %1250 = vmatpush.bf16.msra.mxu1 %v1074_v19  ;;  %v1105_v1 = vsel %vm1053_vm13, %v1046_v56, %v1048_v63 }
 0x245   : > { %1199 = vmatpush.bf16.msrb.mxu2 %v1105_v1 }
 0x249   : > { %1200 = vmatpush.bf16.msrb.mxu2 %v2556_v6  ;;  %v940_v6 = vpop.permute.xlu2 %939 }
 0x24b   : > { %v956_v26 = vpop.permute.xlu0 %955 }
 0x24c   : > { %1858 = vmatmul.msk.bf16.vlgmr.msrb.gmra.mxu2 %vm574_vm0, %v2648_v11  ;;  %v1071_v18 = vsel %vm1053_vm13, %v2348_v54, %v956_v26 }
 0x24d   : > { %1221 = vmatpush.bf16.msra.mxu2 %v2545_v16  ;;  %1251 = vmatpush.bf16.msra.mxu1 %v1071_v18  ;;  %v1103_v16 = vsel %vm1053_vm13, %v2547_v51, %v2639_v23  ;;  %v1085_v51 = vsel %vm1053_vm13, %v2596_v59, %v2590_v14 }
 0x251   : > { %1222 = vmatpush.bf16.msra.mxu2 %v2564_v0  ;;  %v988_v0 = vpop.permute.xlu2 %987 }
 0x252   : > { %v1083_v42 = vsel %vm1053_vm13, %v2502_v57, %v988_v0 }
 0x253   : > { %v1050_v32 = vpop.permute.xlu0 %1049 }
 0x254   : > { %v1106_v58 = vsel %vm1053_vm13, %v1048_v63, %v1050_v32 }
 0x255   : > { %1223 = vmatpush.bf16.msra.mxu2 %v1094_v47  ;;  %1241 = vmatpush.bf16.msra.mxu3 %v1106_v58 }
 0x259   : > { %1224 = vmatpush.bf16.msra.mxu2 %v2573_v44  ;;  %1242 = vmatpush.bf16.msra.mxu3 %v1103_v16  ;;  %v916_v28 = vpop.permute.xlu2 %915 }
 0x25b   : > { %v948_v54 = vpop.permute.xlu0 %947 }
 0x25c   : > { %v1068_v50 = vsel %vm1053_vm13, %v2361_v8, %v948_v54  ;;  %1859 = vmatmul.msk.bf16.vlgmr.msra.gmra.mxu3 %vm574_vm0, %v2648_v11  ;;  %v932_v8 = vpop.permute.xlu1 %931 }
 0x25d   : > { %1225 = vmatpush.bf16.msra.mxu2 %v1088_v5  ;;  %1263 = vmatpush.bf16.msrb.mxu3 %v2523_v46  ;;  %v1065_v46 = vsel %vm1053_vm13, %v2421_v13, %v940_v6  ;;  %v1062_v49 = vsel %vm1053_vm13, %v2450_v30, %v932_v8  ;;  %v1079_v13 = vsel %vm1053_vm13, %v2580_v61, %v2627_v43 }
 0x25e   : > { %1252 = vmatpush.bf16.msra.mxu1 %v1068_v50 }
 0x261   : > { %1226 = vmatpush.bf16.msra.mxu2 %v1085_v51  ;;  %1264 = vmatpush.bf16.msrb.mxu3 %v2567_v52  ;;  %v1092_v52 = vsel %vm1053_vm13, %v2560_v34, %v1012_v31  ;;  %v1056_v34 = vsel %vm1053_vm13, %v2472_v7, %v916_v28  ;;  %v1216_v7 = vpop.f32.mrf.mxu3  ;;  %v887_v45 = vpop.permute.xlu2 %886 }
 0x262   : > { %1253 = vmatpush.bf16.msra.mxu1 %v1065_v46  ;;  %v1217_v35 = vadd.f32 %v1216_v7, %v887_v45 }
 0x263   : > { %v996_v44 = vpop.permute.xlu0 %995 }
 0x264   : > { %v980_v53 = vpop.permute.xlu1 %979  ;;  %v1086_v61 = vsel %vm1053_vm13, %v2590_v14, %v996_v44 }
 0x265   : > { %1227 = vmatpush.bf16.msra.mxu2 %v1082_v38  ;;  %1265 = vmatpush.bf16.msrb.mxu3 %v1095_v41  ;;  %v1080_v59 = vsel %vm1053_vm13, %v2627_v43, %v980_v53 }
 0x266   : > { %1254 = vmatpush.bf16.msra.mxu1 %v1062_v49 }
 0x269   : > { %1228 = vmatpush.bf16.msra.mxu2 %v1079_v13  ;;  %1266 = vmatpush.bf16.msrb.mxu3 %v1092_v52  ;;  %v1218_v55 = vpop.f32.mrf.mxu3 }
 0x26b   : > { %v924_v47 = vpop.permute.xlu0 %923 }
 0x26c   : > { %1229 = vmatmul.bf16.vlgmr.msra.gmra.mxu2 %v2631_v15  ;;  %v1059_v30 = vsel %vm1053_vm13, %v2465_v33, %v924_v47  ;;  %v1044_v33 = vpop.permute.xlu1 %1043 }
 0x26d   : > { %1267 = vmatpush.bf16.msrb.mxu3 %v1089_v62  ;;  %1255 = vmatpush.bf16.msra.mxu1 %v1059_v30  ;;  %v1104_v14 = vsel %vm1053_vm13, %v2639_v23, %v1044_v33 }
 0x271   : > { %1268 = vmatpush.bf16.msrb.mxu3 %v1086_v61  ;;  %1256 = vmatpush.bf16.msra.mxu1 %v1056_v34 }
 0x273   : > { %v1052_v24 = vpop.permute.xlu0 %1051 }
 0x274   : > { %v1107_v5 = vsel %vm1053_vm13, %v1050_v32, %v1052_v24  ;;  %1257 = vmatmul.bf16.vlgmr.msra.gmra.mxu1 %v2535_v29 }
 0x275   : > { %1269 = vmatpush.bf16.msrb.mxu3 %v1083_v42  ;;  %1283 = vmatpush.bf16.msra.mxu0 %v1107_v5 }
 0x279   : > { %1270 = vmatpush.bf16.msrb.mxu3 %v1080_v59  ;;  %1284 = vmatpush.bf16.msra.mxu0 %v1104_v14 }
 0x27b   : > { %v892_v43 = vpop.permute.xlu0 %891 }
 0x27c   : > { %1271 = vmatmul.bf16.vlgmr.msrb.gmra.mxu3 %v2631_v15  ;;  %1860 = vmatmul.msk.bf16.vlgmr.msra.gmra.mxu0 %vm574_vm0, %v2648_v11  ;;  %v1219_v63 = vadd.f32 %v1218_v55, %v892_v43  ;;  %vm1308_vm0 = vcmask 257024  }
 0x2b4   : > { %v1174_v29 = vpop.f32.mrf.mxu0 }
 0x2b5   : > { %v1175_v37 = vadd.f32 %v1174_v29, %v887_v45 }
 0x2bc   : > { %v1188_v2 = vpop.f32.mrf.mxu1  ;;  %v1176_v22 = vpop.f32.mrf.mxu0 }
 0x2bd   : > { %v1189_v39 = vadd.f32 %v1188_v2, %v1175_v37  ;;  %v1177_v4 = vadd.f32 %v1176_v22, %v892_v43 }
 0x2c4   : > { %v1190_v36 = vpop.f32.mrf.mxu1 }
 0x2c5   : > { %v1191_v19 = vadd.f32 %v1190_v36, %v1177_v4 }
 0x2cf   : > { %v1202_v57 = vpop.f32.mrf.mxu2 }
 0x2d0   : > { %v1203_v25 = vadd.f32 %v1202_v57, %v1189_v39 }
 0x2d2   : > { %v1291_v15 = vmax.f32 %v1203_v25, 0.0  ;;  %v1359_v25 = vpop.permute.xlu0 %1358 }
 0x2d4   : > { %v1297_v17 = vmul.f32 %v2171_v9, %v1291_v15 }
 0x2d7   : > { %v1204_v10 = vpop.f32.mrf.mxu2 }
 0x2d8   : > { %v1205_v1 = vadd.f32 %v1204_v10, %v1191_v19 }
 0x2da   : > { %v1294_v58 = vmax.f32 %v1205_v1, 0.0 }
 0x2dc   : > { %v1300_v54 = vmul.f32 %v2171_v9, %v1294_v58 }
 0x2df   : > { %v1244_v56 = vpop.f32.mrf.mxu3 }
 0x2e7   : > { %v1246_v11 = vpop.f32.mrf.mxu3 }
 0x2ef   : > { %v1230_v40 = vpop.f32.mrf.mxu2 }
 0x2f0   : > { %v1231_v12 = vadd.f32 %v1230_v40, %v1217_v35  ;;  %v1348_v40 = vpop.permute.xlu0 %1347 }
 0x2f1   : > { %v1258_v32 = vpop.f32.mrf.mxu1 }
 0x2f2   : > { %v1245_v3 = vadd.f32 %v1244_v56, %v1231_v12  ;;  %v1259_v50 = vadd.f32 %v1258_v32, %v887_v45  ;;  %v1337_v56 = vpop.permute.xlu1 %1336 }
 0x2f4   : > { %v1292_v23 = vmax.f32 %v1245_v3, 0.0 }
 0x2f6   : > { %v1298_v48 = vmul.f32 %v2181_v20, %v1292_v23 }
 0x2f7   : > { %v1232_v26 = vpop.f32.mrf.mxu2 }
 0x2f8   : > { %v1303_v18 = vpack.c.bf16 %v1298_v48, %v1297_v17  ;;  %v1233_v31 = vadd.f32 %v1232_v26, %v1219_v63 }
 0x2f9   : > { %v1286_v6 = vpop.f32.mrf.mxu0  ;;  %v1260_v41 = vpop.f32.mrf.mxu1 }
 0x2fa   : > { %1307 = vst [vmem:[#allocation2 + $0x4] sm:$0xff] %v1303_v18  ;;  %v1247_v27 = vadd.f32 %v1246_v11, %v1233_v31  ;;  %v1261_v44 = vadd.f32 %v1260_v41, %v892_v43  ;;  %v2751_v22 = vpop.permute.xlu1 %1434 }
 0x2fc   : > { %v1295_v16 = vmax.f32 %v1247_v27, 0.0 }
 0x2fe   : > { %v1301_v60 = vmul.f32 %v2181_v20, %v1295_v16 }
 0x2ff   : > { %v1272_v51 = vpop.f32.mrf.mxu3 }
 0x300   : > { %v1305_v46 = vpack.c.bf16 %v1301_v60, %v1300_v54  ;;  %v1273_v8 = vadd.f32 %v1272_v51, %v1259_v50 }
 0x301   : > { %v1288_v52 = vpop.f32.mrf.mxu0  ;;  %v1879_v47 = vld [vmem:[#allocation2 + $0x4] sm:$0xf]  ;;  %v1926_v30 = vld [vmem:[#allocation2 + $0x8] sm:$0xf] }
 0x302   : > { %1310 = vst [vmem:[#allocation2 + $0x14] sm:$0xff] %v1305_v46  ;;  %v1287_v38 = vadd.f32 %v1286_v6, %v1273_v8  ;;  %v1871_v57 = vld [vmem:[#allocation2 + $0x8] sm:$0xf]  ;;  %v1922_v45 = vld [vmem:[#allocation2 + $0x4] sm:$0xf] }
 0x304   : > { %v1293_v0 = vmax.f32 %v1287_v38, 0.0 }
 0x306   : > { %v1299_v49 = vmul.f32 %v2183_v21, %v1293_v0 }
 0x307   : > { %v1274_v13 = vpop.f32.mrf.mxu3 }
 0x308   : > { %v1304_v62 = vpack.c.bf16 %v1299_v49, %v1299_v49  ;;  %v1275_v53 = vadd.f32 %v1274_v13, %v1261_v44 }
 0x309   : > { %v1927_v9 = vld [vmem:[#allocation2 + $0x10] sm:$0xf0]  ;;  %v1881_v28 = vld [vmem:[#allocation2 + $0x14] sm:$0xf0] }
 0x30a   : > { %1309 = vst.msk [vmem:[#allocation2 + $0xc] sm:$0xf] %vm1308_vm0, %v1304_v62  ;;  %v1289_v20 = vadd.f32 %v1288_v52, %v1275_v53  ;;  %v1880_v61 = vor.u32 %v1927_v9, %v1879_v47  ;;  %v1884_v34 = vor.u32 %v1926_v30, %v1881_v28  ;;  %v1925_v7 = vld [vmem:[#allocation2 + $0x14] sm:$0xf0] }
 0x30b   : > { %v2725_v55 = vor.u32 %v1925_v7, %v1871_v57 }
 0x30c   : > { %v1296_v42 = vmax.f32 %v1289_v20, 0.0  ;;  %1398 = vrot.lane.b32.xlu0 %v1880_v61, %s1965_s25  ;;  %1406 = vrot.lane.b32.xlu1 %v1880_v61, %s1964_s24 }
 0x30d   : > { %1408 = vrot.lane.b32.xlu2 %v1884_v34, %s1964_s24 }
 0x30e   : > { %v1302_v24 = vmul.f32 %v2183_v21, %v1296_v42  ;;  %v1865_v21 = vld [vmem:[#allocation2 + $0x10] sm:$0xf0] }
 0x30f   : > { %v1868_v29 = vor.u32 %v1922_v45, %v1865_v21 }
 0x310   : > { %v1306_v5 = vpack.c.bf16 %v1302_v24, %v1302_v24 }
 0x311   : > { %v1887_v33 = vld [vmem:[#allocation2 + $0xc] sm:$0xf] }
 0x312   : > { %1311 = vst.msk [vmem:[#allocation2 + $0x1c] sm:$0xf] %vm1308_vm0, %v1306_v5  ;;  %v1923_v2 = vld [vmem:[#allocation2 + $0xc] sm:$0xf] }
 0x314   : > { %1392 = vrot.lane.b32.xlu0 %v1884_v34, %s1966_s26  ;;  %1400 = vrot.lane.b32.xlu1 %v1884_v34, %s1965_s25 }
 0x315   : > { %1390 = vrot.lane.b32.xlu2 %v1880_v61, %s1966_s26 }
 0x319   : > { %v1928_v59 = vld [vmem:[#allocation2 + $0x18] sm:$0xf0] }
 0x31a   : > { %v1888_v14 = vor.u32 %v1928_v59, %v1887_v33  ;;  %v1873_v37 = vld [vmem:[#allocation2 + $0x18] sm:$0xf0] }
 0x31b   : > { %v2736_v10 = vor.u32 %v1923_v2, %v1873_v37 }
 0x31c   : > { %1382 = vrot.lane.b32.xlu1 %v1880_v61, %s1967_s29  ;;  %1410 = vrot.lane.b32.xlu0 %v1888_v14, %s1964_s24 }
 0x31d   : > { %1384 = vrot.lane.b32.xlu2 %v1884_v34, %s1967_s29 }
 0x324   : > { %1360 = vrot.lane.b32.xlu1 %v1868_v29, %s1963_s23  ;;  %1340 = vrot.lane.b32.xlu0 %v2725_v55, %s1961_s19 }
 0x325   : > { %1362 = vrot.lane.b32.xlu2 %v2725_v55, %s1963_s23 }
 0x32c   : > { %1349 = vrot.lane.b32.xlu1 %v1868_v29, %s1962_s22  ;;  %1386 = vrot.lane.b32.xlu0 %v1888_v14, %s1967_s29 }
 0x32d   : > { %1351 = vrot.lane.b32.xlu2 %v2725_v55, %s1962_s22 }
 0x334   : > { %1402 = vrot.lane.b32.xlu1 %v1888_v14, %s1965_s25  ;;  %1364 = vrot.lane.b32.xlu0 %v2736_v10, %s1963_s23  ;;  %s1929_s25 = smul.u32 6, %s2877_s28 }
 0x335   : > { %1338 = vrot.lane.b32.xlu2 %v1868_v29, %s1961_s19 }
 0x33c   : > { %1414 = vrot.lane.b32.xlu1 %v1880_v61, %s1968_s30 }
 0x33d   : > { %1394 = vrot.lane.b32.xlu2 %v1888_v14, %s1966_s26 }
 0x344   : > { %1353 = vrot.lane.b32.xlu1 %v2736_v10, %s1962_s22 }
 0x345   : > { %1416 = vrot.lane.b32.xlu2 %v1884_v34, %s1968_s30 }
 0x34c   : > { %1342 = vrot.lane.b32.xlu1 %v2736_v10, %s1961_s19 }
 0x34d   : > { %1418 = vrot.lane.b32.xlu2 %v1888_v14, %s1968_s30  ;;  %s325_s30 = scalar_lea.vmem %s2875_s8, %s1929_s25 }
 0x355   : > { %1436 = vrot.lane.b32.xlu2 %v1868_v29, %s1970_s9 }
 0x367   : > { %v1409_v39 = vpop.permute.xlu2 %1408 }
 0x36f   : > { %v1391_v35 = vpop.permute.xlu2 %1390 }
 0x377   : > { %v1385_v12 = vpop.permute.xlu2 %1384 }
 0x37e   : > { %v1399_v43 = vpop.permute.xlu0 %1398  ;;  %v1407_v36 = vpop.permute.xlu1 %1406 }
 0x37f   : > { %v2753_v4 = vpop.permute.xlu2 %1362  ;;  %1482 = vrot.lane.b32.xlu0 %v1399_v43, %s1970_s9  ;;  %1490 = vrot.lane.b32.xlu2 %v1407_v36, %s1970_s9  ;;  %v1412_v6 = vsel %vm756_vm6, %v1407_v36, %v1409_v39  ;;  %v1422_v36 = vld [vmem:[%s2873_s6] sm:$0xf] }
 0x380   : > { %1430 = vst [vmem:[#allocation1] ss:$4 sm:$0xff] %v1422_v36 }
 0x386   : > { %v1393_v15 = vpop.permute.xlu0 %1392  ;;  %v1401_v3 = vpop.permute.xlu1 %1400 }
 0x387   : > { %v1352_v19 = vpop.permute.xlu2 %1351  ;;  %1474 = vrot.lane.b32.xlu2 %v1391_v35, %s1970_s9  ;;  %v1404_v54 = vsel %vm747_vm7, %v1399_v43, %v1401_v3  ;;  %v1396_v60 = vsel %vm738_vm8, %v1391_v35, %v1393_v15 }
 0x38e   : > { %v1411_v23 = vpop.permute.xlu0 %1410  ;;  %v1383_v63 = vpop.permute.xlu1 %1382 }
 0x38f   : > { %v1339_v1 = vpop.permute.xlu2 %1338  ;;  %1496 = vrot.lane.b32.xlu2 %v1411_v23, %s1970_s9  ;;  %1466 = vrot.lane.b32.xlu1 %v1383_v63, %s1970_s9  ;;  %v1388_v17 = vsel %vm729_vm9, %v1383_v63, %v1385_v12  ;;  %v1413_v8 = vsel %vm756_vm6, %v1409_v39, %v1411_v23  ;;  %vm1659_vm6 = vcmask 1043456  }
 0x390   : > { %v1344_v52 = vsel %vm682_vm11, %v1337_v56, %v1339_v1 }
 0x396   : > { %v1361_v48 = vpop.permute.xlu1 %1360  ;;  %v1341_v32 = vpop.permute.xlu0 %1340 }
 0x397   : > { %v1395_v11 = vpop.permute.xlu2 %1394  ;;  %1468 = vrot.lane.b32.xlu2 %v1388_v17, %s1970_s9  ;;  %v1367_v51 = vsel %vm706_vm10, %v1361_v48, %v2753_v4  ;;  %v1366_v38 = vsel %vm706_vm10, %v1359_v25, %v1361_v48  ;;  %v1345_v0 = vsel %vm682_vm11, %v1339_v1, %v1341_v32 }
 0x398   : > { %v1397_v26 = vsel %vm738_vm8, %v1393_v15, %v1395_v11  ;;  %1480 = vrot.lane.b32.xlu1 %v1395_v11, %s1970_s9  ;;  %v1432_v11 = vld.sshfl [vmem:[#allocation1 + $0x8] sm:$0xff pattern:$0x73625140] }
 0x39e   : > { %v1350_v18 = vpop.permute.xlu1 %1349  ;;  %v1387_v27 = vpop.permute.xlu0 %1386 }
 0x39f   : > { %v1355_v31 = vsel %vm694_vm12, %v1348_v40, %v1350_v18  ;;  %v1417_v44 = vpop.permute.xlu2 %1416  ;;  %v1356_v49 = vsel %vm694_vm12, %v1350_v18, %v1352_v19  ;;  %v1389_v13 = vsel %vm729_vm9, %v1385_v12, %v1387_v27 }
 0x3a0   : > { %1450 = vrot.lane.b32.xlu2 %v1355_v31, %s1970_s9 }
 0x3a6   : > { %v1403_v58 = vpop.permute.xlu1 %1402  ;;  %v1365_v62 = vpop.permute.xlu0 %1364 }
 0x3a7   : > { %1488 = vrot.lane.b32.xlu0 %v1403_v58, %s1970_s9  ;;  %v1405_v41 = vsel %vm747_vm7, %v1401_v3, %v1403_v58  ;;  %v1419_v47 = vpop.permute.xlu2 %1418  ;;  %v1368_v61 = vsel %vm706_vm10, %v2753_v4, %v1365_v62  ;;  %vm1665_vm7 = vmor %vm1664_vm4, %vm1663_vm3 }
 0x3a8   : > { %v1421_v42 = vsel %vm765_vm14, %v1417_v44, %v1419_v47 }
 0x3ae   : > { %v1415_v16 = vpop.permute.xlu1 %1414 }
 0x3af   : > { %1472 = vrot.lane.b32.xlu0 %v1387_v27, %s1970_s9  ;;  %1498 = vrot.lane.b32.xlu1 %v1415_v16, %s1970_s9  ;;  %v1420_v53 = vsel %vm765_vm14, %v1415_v16, %v1417_v44  ;;  %v2801_v28 = vpop.permute.xlu2 %1436  ;;  %v1431_v27 = vld.sshfl [vmem:[#allocation1] sm:$0xff pattern:$0x73625140] }
 0x3b0   : > { %v1506_v58 = vsel %vm1053_vm13, %v2751_v22, %v2801_v28 }
 0x3b6   : > { %v1354_v50 = vpop.permute.xlu1 %1353 }
 0x3b7   : > { %1492 = vrot.lane.b32.xlu0 %v1412_v6, %s1970_s9  ;;  %1484 = vrot.lane.b32.xlu1 %v1404_v54, %s1970_s9  ;;  %v1357_v30 = vsel %vm694_vm12, %v1352_v19, %v1354_v50  ;;  %v1423_v6 = vld [vmem:[%s2874_s7] sm:$0xf] }
 0x3be   : > { %v1343_v46 = vpop.permute.xlu1 %1342 }
 0x3bf   : > { %1476 = vrot.lane.b32.xlu0 %v1396_v60, %s1970_s9  ;;  %1460 = vrot.lane.b32.xlu1 %v1367_v51, %s1970_s9  ;;  %v1346_v9 = vsel %vm682_vm11, %v1341_v32, %v1343_v46 }
 0x3c0   : > { %1448 = vrot.lane.b32.xlu2 %v1343_v46, %s1970_s9 }
 0x3c7   : > { %1458 = vrot.lane.b32.xlu0 %v1366_v38, %s1970_s9  ;;  %1494 = vrot.lane.b32.xlu1 %v1413_v8, %s1970_s9 }
 0x3c8   : > { %1486 = vrot.lane.b32.xlu2 %v1405_v41, %s1970_s9 }
 0x3cf   : > { %1452 = vrot.lane.b32.xlu0 %v1356_v49, %s1970_s9  ;;  %1444 = vrot.lane.b32.xlu1 %v1345_v0, %s1970_s9 }
 0x3d0   : > { %1470 = vrot.lane.b32.xlu2 %v1389_v13, %s1970_s9 }
 0x3d7   : > { %1442 = vrot.lane.b32.xlu0 %v1344_v52, %s1970_s9  ;;  %1464 = vrot.lane.b32.xlu1 %v1365_v62, %s1970_s9 }
 0x3d8   : > { %1500 = vrot.lane.b32.xlu2 %v1420_v53, %s1970_s9 }
 0x3d9   : > { %v1491_v20 = vpop.permute.xlu2 %1490 }
 0x3df   : > { %1456 = vrot.lane.b32.xlu0 %v1354_v50, %s1970_s9  ;;  %1446 = vrot.lane.b32.xlu1 %v1346_v9, %s1970_s9 }
 0x3e0   : > { %1454 = vrot.lane.b32.xlu2 %v1357_v30, %s1970_s9 }
 0x3e1   : > { %v1475_v34 = vpop.permute.xlu2 %1474 }
 0x3e7   : > { %1478 = vrot.lane.b32.xlu0 %v1397_v26, %s1970_s9  ;;  %1504 = vrot.lane.b32.xlu1 %v1419_v47, %s1970_s9 }
 0x3e8   : > { %1438 = vrot.lane.b32.xlu2 %v2725_v55, %s1970_s9 }
 0x3e9   : > { %v1497_v24 = vpop.permute.xlu2 %1496 }
 0x3ef   : > { %1462 = vrot.lane.b32.xlu0 %v1368_v61, %s1970_s9  ;;  %1426 = vperm.xlu1 %1951, %v1423_v6  }
 0x3f1   : > { %v2814_v5 = vpop.permute.xlu2 %1468  ;;  %v1483_v59 = vpop.permute.xlu0 %1482 }
 0x3f7   : > { %1502 = vrot.lane.b32.xlu0 %v1421_v42, %s1970_s9 }
 0x3fa   : > { %v1451_v14 = vpop.permute.xlu2 %1450 }
 0x3ff   : > { %1440 = vrot.lane.b32.xlu0 %v2736_v10, %s1970_s9 }
 0x401   : > { %v1467_v33 = vpop.permute.xlu1 %1466 }
 0x402   : > { %v1518_v4 = vsel %vm1053_vm13, %v1467_v33, %v2814_v5 }
 0x40a   : > { %v1481_v7 = vpop.permute.xlu1 %1480 }
 0x419   : > { %v1489_v21 = vpop.permute.xlu0 %1488 }
 0x41a   : > { %v2816_v57 = vpop.permute.xlu2 %1448 }
 0x421   : > { %v1473_v45 = vpop.permute.xlu0 %1472  ;;  %v1499_v55 = vpop.permute.xlu1 %1498 }
 0x422   : > { %v1487_v29 = vpop.permute.xlu2 %1486 }
 0x423   : > { %v1526_v17 = vsel %vm1053_vm13, %v1487_v29, %v1489_v21 }
 0x429   : > { %v1493_v37 = vpop.permute.xlu0 %1492  ;;  %v1485_v2 = vpop.permute.xlu1 %1484 }
 0x42a   : > { %v1527_v39 = vsel %vm1053_vm13, %v1491_v20, %v1493_v37  ;;  %v1471_v56 = vpop.permute.xlu2 %1470  ;;  %v1524_v10 = vsel %vm1053_vm13, %v1483_v59, %v1485_v2  ;;  %v1525_v1 = vsel %vm1053_vm13, %v1485_v2, %v1487_v29 }
 0x42b   : > { %1563 = vmatpush.bf16.msrb.mxu2 %v1527_v39  ;;  %v1519_v22 = vsel %vm1053_vm13, %v2814_v5, %v1471_v56  ;;  %v1520_v46 = vsel %vm1053_vm13, %v1471_v56, %v1473_v45 }
 0x42f   : > { %1564 = vmatpush.bf16.msrb.mxu2 %v1524_v10 }
 0x431   : > { %v1477_v25 = vpop.permute.xlu0 %1476  ;;  %v1461_v35 = vpop.permute.xlu1 %1460 }
 0x432   : > { %v1501_v40 = vpop.permute.xlu2 %1500  ;;  %v1521_v12 = vsel %vm1053_vm13, %v1475_v34, %v1477_v25 }
 0x433   : > { %v1530_v43 = vsel %vm1053_vm13, %v1499_v55, %v1501_v40  ;;  %1565 = vmatpush.bf16.msrb.mxu2 %v1521_v12 }
 0x434   : > { %1583 = vmatpush.bf16.msrb.mxu0 %v1530_v43 }
 0x437   : > { %1566 = vmatpush.bf16.msrb.mxu2 %v1518_v4  ;;  %1889 = vmatmul.msk.bf16.vlgmr.msrb.gmra.mxu0 %vm1560_vm15, %v1432_v11 }
 0x439   : > { %v1459_v15 = vpop.permute.xlu0 %1458  ;;  %v1495_v3 = vpop.permute.xlu1 %1494 }
 0x43a   : > { %v1528_v19 = vsel %vm1053_vm13, %v1493_v37, %v1495_v3  ;;  %v1529_v23 = vsel %vm1053_vm13, %v1495_v3, %v1497_v24  ;;  %v1515_v63 = vsel %vm1053_vm13, %v1459_v15, %v1461_v35  ;;  %v1455_v38 = vpop.permute.xlu2 %1454 }
 0x43b   : > { %1567 = vmatpush.bf16.msrb.mxu2 %v1515_v63  ;;  %1589 = vmatpush.bf16.msrb.mxu1 %v1528_v19 }
 0x43c   : > { %1615 = vmatpush.bf16.msra.mxu0 %v1529_v23 }
 0x43f   : > { %1590 = vmatpush.bf16.msrb.mxu1 %v1525_v1 }
 0x440   : > { %1616 = vmatpush.bf16.msra.mxu0 %v1526_v17 }
 0x441   : > { %v1453_v48 = vpop.permute.xlu0 %1452  ;;  %v1445_v18 = vpop.permute.xlu1 %1444 }
 0x442   : > { %v1512_v26 = vsel %vm1053_vm13, %v1451_v14, %v1453_v48  ;;  %v1513_v49 = vsel %vm1053_vm13, %v1453_v48, %v1455_v38  ;;  %v1439_v30 = vpop.permute.xlu2 %1438 }
 0x443   : > { %1568 = vmatpush.bf16.msrb.mxu2 %v1512_v26  ;;  %v1507_v61 = vsel %vm1053_vm13, %v2801_v28, %v1439_v30 }
 0x449   : > { %v1443_v31 = vpop.permute.xlu0 %1442  ;;  %v1465_v54 = vpop.permute.xlu1 %1464 }
 0x44a   : > { %v1509_v32 = vsel %vm1053_vm13, %v1443_v31, %v1445_v18 }
 0x44b   : > { %1569 = vmatpush.bf16.msrb.mxu2 %v1509_v32 }
 0x44f   : > { %1570 = vmatpush.bf16.msrb.mxu2 %v1506_v58 }
 0x451   : > { %v1457_v16 = vpop.permute.xlu0 %1456  ;;  %v1447_v8 = vpop.permute.xlu1 %1446 }
 0x452   : > { %1571 = vmatmul.bf16.vlgmr.msrb.gmra.mxu2 %v1431_v27  ;;  %v1514_v13 = vsel %vm1053_vm13, %v1455_v38, %v1457_v16  ;;  %v1510_v9 = vsel %vm1053_vm13, %v1445_v18, %v1447_v8  ;;  %v1511_v20 = vsel %vm1053_vm13, %v1447_v8, %v2816_v57 }
 0x459   : > { %v1479_v50 = vpop.permute.xlu0 %1478  ;;  %v1505_v52 = vpop.permute.xlu1 %1504 }
 0x45a   : > { %v1522_v60 = vsel %vm1053_vm13, %v1477_v25, %v1479_v50  ;;  %v1523_v51 = vsel %vm1053_vm13, %v1479_v50, %v1481_v7 }
 0x45b   : > { %1591 = vmatpush.bf16.msrb.mxu1 %v1522_v60  ;;  %1617 = vmatpush.bf16.msra.mxu0 %v1523_v51 }
 0x45f   : > { %1592 = vmatpush.bf16.msrb.mxu1 %v1519_v22  ;;  %1618 = vmatpush.bf16.msra.mxu0 %v1520_v46 }
 0x461   : > { %v1463_v41 = vpop.permute.xlu0 %1462  ;;  %v1427_v14 = vpop.permute.xlu1 %1426 }
 0x462   : > { %v1516_v0 = vsel %vm1053_vm13, %v1461_v35, %v1463_v41  ;;  %v1517_v44 = vsel %vm1053_vm13, %v1463_v41, %v1465_v54 }
 0x463   : > { %1593 = vmatpush.bf16.msrb.mxu1 %v1516_v0  ;;  %1619 = vmatpush.bf16.msra.mxu0 %v1517_v44 }
 0x467   : > { %1594 = vmatpush.bf16.msrb.mxu1 %v1513_v49  ;;  %1620 = vmatpush.bf16.msra.mxu0 %v1514_v13 }
 0x469   : > { %v1503_v62 = vpop.permute.xlu0 %1502 }
 0x46a   : > { %v1531_v53 = vsel %vm1053_vm13, %v1501_v40, %v1503_v62  ;;  %v1532_v47 = vsel %vm1053_vm13, %v1503_v62, %v1505_v52 }
 0x46b   : > { %1595 = vmatpush.bf16.msrb.mxu1 %v1510_v9  ;;  %1609 = vmatpush.bf16.msra.mxu3 %v1531_v53 }
 0x46c   : > { %1621 = vmatpush.bf16.msra.mxu0 %v1511_v20  ;;  %1635 = vmatpush.bf16.msra.mxu2 %v1532_v47 }
 0x46e   : > { %1890 = vmatmul.msk.bf16.vlgmr.msra.gmra.mxu3 %vm1560_vm15, %v1432_v11 }
 0x46f   : > { %1596 = vmatpush.bf16.msrb.mxu1 %v1507_v61  ;;  %1891 = vmatmul.msk.bf16.vlgmr.msra.gmra.mxu2 %vm1560_vm15, %v1432_v11 }
 0x471   : > { %v1441_v34 = vpop.permute.xlu0 %1440 }
 0x472   : > { %1597 = vmatmul.bf16.vlgmr.msrb.gmra.mxu1 %v1431_v27  ;;  %v1508_v42 = vsel %vm1053_vm13, %v1439_v30, %v1441_v34 }
 0x473   : > { %1622 = vmatpush.bf16.msra.mxu0 %v1508_v42 }
 0x476   : > { %1623 = vmatmul.bf16.vlgmr.msra.gmra.mxu0 %v1431_v27 }
 0x4b4   : > { %v1585_v24 = vpop.f32.mrf.mxu0 }
 0x4bc   : > { %v1587_v5 = vpop.f32.mrf.mxu0 }
 0x4d5   : > { %v1572_v33 = vpop.f32.mrf.mxu2 }
 0x4d6   : > { %v1573_v7 = vadd.f32 %v1572_v33, %v1427_v14 }
 0x4d8   : > { %v1586_v57 = vadd.f32 %v1585_v24, %v1573_v7 }
 0x4da   : > { %v1641_v2 = vmax.f32 %v1586_v57, 0.0 }
 0x4dd   : > { %v1574_v59 = vpop.f32.mrf.mxu2 }
 0x4ef   : > { %v1598_v21 = vpop.f32.mrf.mxu1 }
 0x4f0   : > { %v1599_v45 = vadd.f32 %v1598_v21, %v1427_v14 }
 0x4f1   : > { %v1611_v28 = vpop.f32.mrf.mxu3 }
 0x4f2   : > { %v1612_v55 = vadd.f32 %v1611_v28, %v1599_v45  ;;  %v1637_v29 = vpop.f32.mrf.mxu2 }
 0x4f3   : > { %v1624_v37 = vpop.f32.mrf.mxu0 }
 0x4f4   : > { %v1642_v39 = vmax.f32 %v1612_v55, 0.0  ;;  %v1625_v56 = vadd.f32 %v1624_v37, %v1427_v14 }
 0x4f6   : > { %v1644_v10 = vpack.c.bf16 %v1642_v39, %v1641_v2  ;;  %v1638_v25 = vadd.f32 %v1637_v29, %v1625_v56 }
 0x4f7   : > { %v1600_v35 = vpop.f32.mrf.mxu1 }
 0x4f8   : > { %v1643_v40 = vmax.f32 %v1638_v25, 0.0  ;;  %v1648_v43 = vrot.slane %v1644_v10, 2 }
 0x4f9   : > { %v1613_v12 = vpop.f32.mrf.mxu3 }
 0x4fa   : > { %v1645_v36 = vpack.c.bf16 %v1643_v40, %v1643_v40  ;;  %v1639_v4 = vpop.f32.mrf.mxu2  ;;  %v1654_v23 = vsel %vm1651_vm2, %v1644_v10, %v1648_v43 }
 0x4fb   : > { %v1626_v15 = vpop.f32.mrf.mxu0 }
 0x4fc   : > { %v1649_v3 = vrot.slane %v1645_v36, 4  ;;  %v1650_v19 = vrot.slane %v1645_v36, 6 }
 0x4fe   : > { %v1658_v63 = vsel %vm1655_vm5, %v1649_v3, %v1650_v19 }
 0x4ff   : > { %v1660_v1 = vsel %vm1659_vm6, %v1654_v23, %v1658_v63 }
 0x500   : > { %1666 = vst.msk [vmem:[%s325_s30] sm:$0x3f] %vm1665_vm7, %v1660_v1 }
 0x501 PF: > { %s18_s27 = sadd.s32 1, %s1958_s27  }
 0x502   : > { %p15_p4 = scmp.ge.s32.totalorder %s18_s27, 4  }
 0x504   :  { %17 = sbr.rel (!%p15_p4) target bundleno = 1 (0x1), region = 85 }

</bundles_post_ra>
